<compile_context>
chip_gen: v6e
topology: v6e:2x2x1
jax: 0.10.0
libtpu: 0.0.40
codegen_flags: <defaults>
</compile_context>

<pallas_src>
import math

import jax
import jax.numpy as jnp
from jax.experimental import pallas as pl
from jax.experimental.pallas import tpu as pltpu


def _chip_vmem_cap_bytes():
    """Generation-aware scoped-VMEM cap (v7x TensorCores only have 64 MiB)."""
    kind = ""
    try:
        kind = jax.devices()[0].device_kind.lower()
    except Exception:
        pass
    return (48 if "v7" in kind else 100) * 1024 * 1024


def _vmem_limit_bytes(L, nb, E, mm_bytes):
    act_io = 2 * 2 * (L * nb * E) * 4                       # x + out, 2 buffers
    weights = 8 * E * E * mm_bytes + 6 * E * 4               # 8E^2 weights + biases
    weights *= 2                                             # worst case: double-buffered
    temps = nb * (L * 3 * E + 2 * L * L + L * 2 * E + 5 * L * E) * 4
    budget = int(1.3 * (act_io + weights + temps)) + (1 << 20)
    return min(max(budget, 32 * 1024 * 1024), _chip_vmem_cap_bytes())


def hetero_context_attention(x_lne, packed):
    """x_lne: (L, N, E) float32 in PyTorch nn.MultiheadAttention convention.

    packed = (wqkv, bqkv, wo, bo, wxgt, wagt, bgt) from pack_params().  The
    matmul dtype is inferred from the packed weight dtype (bf16 recommended
    for production on v5e/v6e/v7x MXUs; f32 accumulation always).
    """
    L, N, E = x_lne.shape
    wqkv, bqkv, wo, bo, wxgt, wagt, bgt = packed
    mm_dt = wqkv.dtype

    # Grid over batch elements when the (L, E) lane slices are tile-aligned;
    # otherwise one full-array block (toy / unaligned sizes).
    aligned = (E % 128 == 0) and (L % 8 == 0)
    nb = 1 if aligned else N                     # batch elements per grid step
    grid_len = N // nb

    vmem_limit = _vmem_limit_bytes(L, nb, E, jnp.dtype(mm_dt).itemsize)

    def kernel(x_ref, wqkv_ref, bqkv_ref, wo_ref, bo_ref,
               wxgt_ref, wagt_ref, bgt_ref, o_ref):
        # x_ref: (L, nb*E) slab of the native (L, N, E) layout; columns
        # [b*E:(b+1)*E] hold batch element b.  nb == 1 on the aligned path,
        # so every slice below is then a whole-ref (free) view.
        wqkv_v = wqkv_ref[...]          # (E, 3E), already in mm_dt
        wo_v = wo_ref[...]              # (E, E)
        wxgt_v = wxgt_ref[...]          # (E, 2E)
        wagt_v = wagt_ref[...]          # (E, 2E)
        bqkv_v = bqkv_ref[...]          # (1, 3E) f32
        bo_v = bo_ref[...]              # (1, E)  f32
        bgt_v = bgt_ref[...]            # (1, 2E) f32

        for b in range(nb):             # static Python loop (nb is tiny)
            lo, hi = b * E, (b + 1) * E
            xb = x_ref[:, lo:hi].astype(jnp.float32)          # (L, E)
            xb_m = xb.astype(mm_dt)                           # single cast

            # fused QKV projection (1/sqrt(E) pre-folded into Wq / bq)
            qkv = jnp.dot(xb_m, wqkv_v,
                          preferred_element_type=jnp.float32) + bqkv_v  # (L, 3E)
            qkv_m = qkv.astype(mm_dt)                         # single cast, then slice
            q = qkv_m[:, :E]
            k = qkv_m[:, E:2 * E]
            v = qkv_m[:, 2 * E:]

            # scores: contract last dims directly (MXU-native trans_b, no k.T)
            s = jax.lax.dot_general(q, k, (((1,), (1,)), ((), ())),
                                    preferred_element_type=jnp.float32)  # (L, L)
            s = s - jnp.max(s, axis=-1, keepdims=True)
            p = jnp.exp(s)
            p = p * pl.reciprocal(jnp.sum(p, axis=-1, keepdims=True), approx=True)

            attn = jnp.dot(p.astype(mm_dt), v,
                           preferred_element_type=jnp.float32)           # (L, E)
            attn_out = jnp.dot(attn.astype(mm_dt), wo_v,
                               preferred_element_type=jnp.float32) + bo_v
            attn_out_m = attn_out.astype(mm_dt)

            # gated fusion: cat([x, attn_out]) @ [Wg|Wt] as two packed matmuls
            gt = (jnp.dot(xb_m, wxgt_v, preferred_element_type=jnp.float32)
                  + jnp.dot(attn_out_m, wagt_v, preferred_element_type=jnp.float32)
                  + bgt_v)                                               # (L, 2E)
            gate = jax.nn.sigmoid(gt[:, :E])
            t = gt[:, E:]
            # gate*x + (1-gate)*t == t + gate*(x - t)  (one fewer full-tile mul)
            o_ref[:, lo:hi] = (t + gate * (xb - t)).astype(o_ref.dtype)

    x2d = x_lne.reshape(L, N * E)                 # free metadata reshape
    out_shape = jax.ShapeDtypeStruct((L, N * E), x_lne.dtype)

    def build(single_buffer_weights):
        def wspec(arr):
            # Constant index_map: Pallas does not re-fetch across grid steps;
            # Buffered(1) additionally drops the dead second pipeline buffer.
            if single_buffer_weights:
                return pl.BlockSpec(arr.shape, lambda n: (0, 0),
                                    pipeline_mode=pl.Buffered(1))
            return pl.BlockSpec(arr.shape, lambda n: (0, 0))

        grid_spec = pltpu.PrefetchScalarGridSpec(
            num_scalar_prefetch=0,
            grid=(grid_len,),
            in_specs=[
                pl.BlockSpec((L, nb * E), lambda n: (0, n)),   # x slab
                wspec(wqkv), wspec(bqkv),
                wspec(wo), wspec(bo),
                wspec(wxgt), wspec(wagt), wspec(bgt),
            ],
            out_specs=pl.BlockSpec((L, nb * E), lambda n: (0, n)),
        )
        return pl.pallas_call(
            kernel,
            out_shape=out_shape,
            grid_spec=grid_spec,
            compiler_params=pltpu.CompilerParams(
                dimension_semantics=("parallel",),
                vmem_limit_bytes=vmem_limit,
            ),
        )

    args = (x2d, wqkv, bqkv, wo, bo, wxgt, wagt, bgt)
    try:
        out2d = build(True)(*args)
    except Exception:
        # Fallback for JAX versions that reject pipeline_mode=pl.Buffered(1).
        out2d = build(False)(*args)

    return out2d.reshape(L, N, E)                 # free metadata reshape


def init_params(key, hidden_dim):
    """Deterministic synthetic parameters (no checkpoint load).

    Weights are stored already transposed for right-multiplication (act @ W).
    """
    E = hidden_dim
    ks = jax.random.split(key, 14)

    def u(k, shape, fan_in):
        bound = 1.0 / math.sqrt(fan_in)
        return jax.random.uniform(k, shape, jnp.float32, -bound, bound)

    return dict(
        Wq=u(ks[0], (E, E), E), Wk=u(ks[1], (E, E), E), Wv=u(ks[2], (E, E), E),
        Wo=u(ks[3], (E, E), E),
        bq=u(ks[4], (1, E), E), bk=u(ks[5], (1, E), E), bv=u(ks[6], (1, E), E),
        bo=u(ks[7], (1, E), E),
        # gate / transform: Linear(2E, E) split into x-part and attn-part
        Wgx=u(ks[8], (E, E), 2 * E), Wga=u(ks[9], (E, E), 2 * E),
        Wtx=u(ks[10], (E, E), 2 * E), Wta=u(ks[11], (E, E), 2 * E),
        bg=u(ks[12], (1, E), 2 * E), bt=u(ks[13], (1, E), 2 * E),
    )


def pack_params(p, hidden_dim, matmul_dtype=jnp.float32):
    """One-time packing: fuse QKV into (E, 3E), gate/transform into (E, 2E)
    pairs, fold the 1/sqrt(E) attention scale into Wq / bq (in f32, before
    any downcast), and cast the weights to the matmul dtype.  Biases stay
    f32 (added post-matmul on the VPU)."""
    E = hidden_dim
    scale = 1.0 / math.sqrt(E)
    wqkv = jnp.concatenate([p["Wq"] * scale, p["Wk"], p["Wv"]], axis=1)  # (E, 3E)
    bqkv = jnp.concatenate([p["bq"] * scale, p["bk"], p["bv"]], axis=1)  # (1, 3E)
    wxgt = jnp.concatenate([p["Wgx"], p["Wtx"]], axis=1)                 # (E, 2E)
    wagt = jnp.concatenate([p["Wga"], p["Wta"]], axis=1)                 # (E, 2E)
    bgt = jnp.concatenate([p["bg"], p["bt"]], axis=1)                    # (1, 2E)
    dt = matmul_dtype
    return (wqkv.astype(dt), bqkv, p["Wo"].astype(dt), p["bo"],
            wxgt.astype(dt), wagt.astype(dt), bgt)


def reference(x_lne, p):
    """Pure-JAX reference matching the PyTorch forward (unpacked params)."""
    x = x_lne.astype(jnp.float32)                          # (L, N, E)
    E = x.shape[-1]
    q = jnp.einsum("lne,ef->lnf", x, p["Wq"]) + p["bq"]
    k = jnp.einsum("lne,ef->lnf", x, p["Wk"]) + p["bk"]
    v = jnp.einsum("lne,ef->lnf", x, p["Wv"]) + p["bv"]
    s = jnp.einsum("lnf,mnf->nlm", q, k) / math.sqrt(E)
    pr = jax.nn.softmax(s, axis=-1)
    attn = jnp.einsum("nlm,mnf->lnf", pr, v)
    attn_out = jnp.einsum("lnf,fg->lng", attn, p["Wo"]) + p["bo"]
    gate = jax.nn.sigmoid(
        jnp.einsum("lne,ef->lnf", x, p["Wgx"])
        + jnp.einsum("lne,ef->lnf", attn_out, p["Wga"]) + p["bg"]
    )
    transformed = (
        jnp.einsum("lne,ef->lnf", x, p["Wtx"])
        + jnp.einsum("lne,ef->lnf", attn_out, p["Wta"]) + p["bt"]
    )
    return gate * x + (1.0 - gate) * transformed


if __name__ == "__main__":
    L, N, E = 8, 2, 32           # seq, batch, hidden_dim (= input_dim)
    key = jax.random.PRNGKey(0)
    kx, kp = jax.random.split(key)

    x = jax.random.normal(kx, (L, N, E), jnp.float32)      # PyTorch (L, N, E)
    params = init_params(kp, E)
    ref = reference(x, params)

    ok = True

    # f32 matmul path: tight tolerance (approx-reciprocal softmax only).
    out_f32 = hetero_context_attention(x, pack_params(params, E, jnp.float32))
    out_f32 = jax.block_until_ready(out_f32)
    err_f32 = float(jnp.max(jnp.abs(out_f32 - ref)))
    ok &= (out_f32.shape == (L, N, E)) and (err_f32 < 2e-3)

    # bf16 MXU path (production recommendation for v5e/v6e/v7x): tolerance
    # gated on the matmul dtype per the correctness review.
    out_bf16 = hetero_context_attention(x, pack_params(params, E, jnp.bfloat16))
    out_bf16 = jax.block_until_ready(out_bf16)
    err_bf16 = float(jnp.max(jnp.abs(out_bf16 - ref)))
    ok &= (out_bf16.shape == (L, N, E)) and (err_bf16 < 5e-2)

    if ok:
        print("KERNEL_OK")
    else:
        print(f"MISMATCH f32_err={err_f32} bf16_err={err_bf16}")
</pallas_src>

<mosaic_0001>
module attributes {stable_mosaic.version = 11 : i64} {
  func.func @kernel(%arg0: i32, %arg1: memref<8x64xf32, #tpu.memory_space<vmem>>, %arg2: memref<32x96xf32, #tpu.memory_space<vmem>>, %arg3: memref<1x96xf32, #tpu.memory_space<vmem>>, %arg4: memref<32x32xf32, #tpu.memory_space<vmem>>, %arg5: memref<1x32xf32, #tpu.memory_space<vmem>>, %arg6: memref<32x64xf32, #tpu.memory_space<vmem>>, %arg7: memref<32x64xf32, #tpu.memory_space<vmem>>, %arg8: memref<1x64xf32, #tpu.memory_space<vmem>>, %arg9: memref<8x64xf32, #tpu.memory_space<vmem>>) attributes {dimension_semantics = [#tpu.dimension_semantics<parallel>], iteration_bounds = array<i64: 1>, scalar_prefetch = 0 : i64, scratch_operands = 0 : i64, tpu.core_type = #tpu.core_type<tc>, window_params = [{transform_indices = @transform_0, window_bounds = array<i64: 8, 64>}, {pipeline_mode = #tpu.pipeline_mode<synchronous>, transform_indices = @transform_1, window_bounds = array<i64: 32, 96>}, {pipeline_mode = #tpu.pipeline_mode<synchronous>, transform_indices = @transform_2, window_bounds = array<i64: 1, 96>}, {pipeline_mode = #tpu.pipeline_mode<synchronous>, transform_indices = @transform_3, window_bounds = array<i64: 32, 32>}, {pipeline_mode = #tpu.pipeline_mode<synchronous>, transform_indices = @transform_4, window_bounds = array<i64: 1, 32>}, {pipeline_mode = #tpu.pipeline_mode<synchronous>, transform_indices = @transform_5, window_bounds = array<i64: 32, 64>}, {pipeline_mode = #tpu.pipeline_mode<synchronous>, transform_indices = @transform_6, window_bounds = array<i64: 32, 64>}, {pipeline_mode = #tpu.pipeline_mode<synchronous>, transform_indices = @transform_7, window_bounds = array<i64: 1, 64>}, {transform_indices = @transform_8, window_bounds = array<i64: 8, 64>}]} {
    %c0 = arith.constant 0 : index
    %c0_0 = arith.constant 0 : index
    %0 = vector.load %arg2[%c0, %c0_0] : memref<32x96xf32, #tpu.memory_space<vmem>>, vector<32x96xf32>
    %c0_1 = arith.constant 0 : index
    %c0_2 = arith.constant 0 : index
    %1 = vector.load %arg4[%c0_1, %c0_2] : memref<32x32xf32, #tpu.memory_space<vmem>>, vector<32x32xf32>
    %c0_3 = arith.constant 0 : index
    %c0_4 = arith.constant 0 : index
    %2 = vector.load %arg6[%c0_3, %c0_4] : memref<32x64xf32, #tpu.memory_space<vmem>>, vector<32x64xf32>
    %c0_5 = arith.constant 0 : index
    %c0_6 = arith.constant 0 : index
    %3 = vector.load %arg7[%c0_5, %c0_6] : memref<32x64xf32, #tpu.memory_space<vmem>>, vector<32x64xf32>
    %c0_7 = arith.constant 0 : index
    %c0_8 = arith.constant 0 : index
    %4 = vector.load %arg3[%c0_7, %c0_8] : memref<1x96xf32, #tpu.memory_space<vmem>>, vector<1x96xf32>
    %c0_9 = arith.constant 0 : index
    %c0_10 = arith.constant 0 : index
    %5 = vector.load %arg5[%c0_9, %c0_10] : memref<1x32xf32, #tpu.memory_space<vmem>>, vector<1x32xf32>
    %c0_11 = arith.constant 0 : index
    %c0_12 = arith.constant 0 : index
    %6 = vector.load %arg8[%c0_11, %c0_12] : memref<1x64xf32, #tpu.memory_space<vmem>>, vector<1x64xf32>
    %c0_13 = arith.constant 0 : index
    %c0_14 = arith.constant 0 : index
    %7 = vector.load %arg1[%c0_13, %c0_14] : memref<8x64xf32, #tpu.memory_space<vmem>>, vector<8x32xf32>
    %cst = arith.constant dense<0.000000e+00> : vector<8x96xf32>
    %8 = tpu.matmul %7, %0, %cst {dimension_numbers = #tpu.dot_dimension_numbers<[1], [0], [0], [1], [0, 0, 1, 1], [], []>} : vector<8x32xf32>, vector<32x96xf32>, vector<8x96xf32> -> vector<8x96xf32>
    %9 = vector.broadcast %4 : vector<1x96xf32> to vector<8x96xf32>
    %10 = arith.addf %8, %9 : vector<8x96xf32>
    %11 = vector.extract_strided_slice %10 {offsets = [0, 0], sizes = [8, 32], strides = [1, 1]} : vector<8x96xf32> to vector<8x32xf32>
    %12 = vector.extract_strided_slice %10 {offsets = [0, 32], sizes = [8, 32], strides = [1, 1]} : vector<8x96xf32> to vector<8x32xf32>
    %13 = vector.extract_strided_slice %10 {offsets = [0, 64], sizes = [8, 32], strides = [1, 1]} : vector<8x96xf32> to vector<8x32xf32>
    %cst_15 = arith.constant dense<0.000000e+00> : vector<8x8xf32>
    %14 = tpu.matmul %11, %12, %cst_15 {dimension_numbers = #tpu.dot_dimension_numbers<[1], [1], [0], [0], [0, 0, 1, 0], [], []>} : vector<8x32xf32>, vector<8x32xf32>, vector<8x8xf32> -> vector<8x8xf32>
    %cst_16 = arith.constant dense<0xFF800000> : vector<8xf32>
    %15 = vector.multi_reduction <maximumf>, %14, %cst_16 [1] : vector<8x8xf32> to vector<8xf32>
    %16 = vector.shape_cast %15 : vector<8xf32> to vector<8x1xf32>
    %17 = vector.broadcast %16 : vector<8x1xf32> to vector<8x8xf32>
    %18 = arith.subf %14, %17 : vector<8x8xf32>
    %19 = math.exp %18 : vector<8x8xf32>
    %cst_17 = arith.constant dense<0.000000e+00> : vector<8xf32>
    %20 = vector.multi_reduction <add>, %19, %cst_17 [1] : vector<8x8xf32> to vector<8xf32>
    %21 = vector.shape_cast %20 : vector<8xf32> to vector<8x1xf32>
    %22 = tpu.reciprocal %21 {approx = true} : vector<8x1xf32> -> vector<8x1xf32>
    %23 = vector.broadcast %22 : vector<8x1xf32> to vector<8x8xf32>
    %24 = arith.mulf %19, %23 : vector<8x8xf32>
    %cst_18 = arith.constant dense<0.000000e+00> : vector<8x32xf32>
    %25 = tpu.matmul %24, %13, %cst_18 {dimension_numbers = #tpu.dot_dimension_numbers<[1], [0], [0], [1], [0, 0, 1, 1], [], []>} : vector<8x8xf32>, vector<8x32xf32>, vector<8x32xf32> -> vector<8x32xf32>
    %cst_19 = arith.constant dense<0.000000e+00> : vector<8x32xf32>
    %26 = tpu.matmul %25, %1, %cst_19 {dimension_numbers = #tpu.dot_dimension_numbers<[1], [0], [0], [1], [0, 0, 1, 1], [], []>} : vector<8x32xf32>, vector<32x32xf32>, vector<8x32xf32> -> vector<8x32xf32>
    %27 = vector.broadcast %5 : vector<1x32xf32> to vector<8x32xf32>
    %28 = arith.addf %26, %27 : vector<8x32xf32>
    %cst_20 = arith.constant dense<0.000000e+00> : vector<8x64xf32>
    %29 = tpu.matmul %7, %2, %cst_20 {dimension_numbers = #tpu.dot_dimension_numbers<[1], [0], [0], [1], [0, 0, 1, 1], [], []>} : vector<8x32xf32>, vector<32x64xf32>, vector<8x64xf32> -> vector<8x64xf32>
    %cst_21 = arith.constant dense<0.000000e+00> : vector<8x64xf32>
    %30 = tpu.matmul %28, %3, %cst_21 {dimension_numbers = #tpu.dot_dimension_numbers<[1], [0], [0], [1], [0, 0, 1, 1], [], []>} : vector<8x32xf32>, vector<32x64xf32>, vector<8x64xf32> -> vector<8x64xf32>
    %31 = arith.addf %29, %30 : vector<8x64xf32>
    %32 = vector.broadcast %6 : vector<1x64xf32> to vector<8x64xf32>
    %33 = arith.addf %31, %32 : vector<8x64xf32>
    %34 = vector.extract_strided_slice %33 {offsets = [0, 0], sizes = [8, 32], strides = [1, 1]} : vector<8x64xf32> to vector<8x32xf32>
    %35 = arith.negf %34 : vector<8x32xf32>
    %36 = math.exp %35 : vector<8x32xf32>
    %cst_22 = arith.constant 1.000000e+00 : f32
    %37 = vector.broadcast %cst_22 : f32 to vector<8x32xf32>
    %38 = arith.addf %37, %36 : vector<8x32xf32>
    %39 = arith.divf %37, %38 : vector<8x32xf32>
    %40 = vector.extract_strided_slice %33 {offsets = [0, 32], sizes = [8, 32], strides = [1, 1]} : vector<8x64xf32> to vector<8x32xf32>
    %41 = arith.subf %7, %40 : vector<8x32xf32>
    %42 = arith.mulf %39, %41 : vector<8x32xf32>
    %43 = arith.addf %40, %42 : vector<8x32xf32>
    %c0_23 = arith.constant 0 : index
    %c0_24 = arith.constant 0 : index
    %44 = vector.load %arg9[%c0_23, %c0_24] : memref<8x64xf32, #tpu.memory_space<vmem>>, vector<8x32xf32>
    tpu.vector_store %arg9[%c0_23, %c0_24], %43 {strides = array<i32>} : memref<8x64xf32, #tpu.memory_space<vmem>>, vector<8x32xf32>,
    %c0_25 = arith.constant 0 : index
    %c32 = arith.constant 32 : index
    %45 = vector.load %arg1[%c0_25, %c32] : memref<8x64xf32, #tpu.memory_space<vmem>>, vector<8x32xf32>
    %cst_26 = arith.constant dense<0.000000e+00> : vector<8x96xf32>
    %46 = tpu.matmul %45, %0, %cst_26 {dimension_numbers = #tpu.dot_dimension_numbers<[1], [0], [0], [1], [0, 0, 1, 1], [], []>} : vector<8x32xf32>, vector<32x96xf32>, vector<8x96xf32> -> vector<8x96xf32>
    %47 = vector.broadcast %4 : vector<1x96xf32> to vector<8x96xf32>
    %48 = arith.addf %46, %47 : vector<8x96xf32>
    %49 = vector.extract_strided_slice %48 {offsets = [0, 0], sizes = [8, 32], strides = [1, 1]} : vector<8x96xf32> to vector<8x32xf32>
    %50 = vector.extract_strided_slice %48 {offsets = [0, 32], sizes = [8, 32], strides = [1, 1]} : vector<8x96xf32> to vector<8x32xf32>
    %51 = vector.extract_strided_slice %48 {offsets = [0, 64], sizes = [8, 32], strides = [1, 1]} : vector<8x96xf32> to vector<8x32xf32>
    %cst_27 = arith.constant dense<0.000000e+00> : vector<8x8xf32>
    %52 = tpu.matmul %49, %50, %cst_27 {dimension_numbers = #tpu.dot_dimension_numbers<[1], [1], [0], [0], [0, 0, 1, 0], [], []>} : vector<8x32xf32>, vector<8x32xf32>, vector<8x8xf32> -> vector<8x8xf32>
    %cst_28 = arith.constant dense<0xFF800000> : vector<8xf32>
    %53 = vector.multi_reduction <maximumf>, %52, %cst_28 [1] : vector<8x8xf32> to vector<8xf32>
    %54 = vector.shape_cast %53 : vector<8xf32> to vector<8x1xf32>
    %55 = vector.broadcast %54 : vector<8x1xf32> to vector<8x8xf32>
    %56 = arith.subf %52, %55 : vector<8x8xf32>
    %57 = math.exp %56 : vector<8x8xf32>
    %cst_29 = arith.constant dense<0.000000e+00> : vector<8xf32>
    %58 = vector.multi_reduction <add>, %57, %cst_29 [1] : vector<8x8xf32> to vector<8xf32>
    %59 = vector.shape_cast %58 : vector<8xf32> to vector<8x1xf32>
    %60 = tpu.reciprocal %59 {approx = true} : vector<8x1xf32> -> vector<8x1xf32>
    %61 = vector.broadcast %60 : vector<8x1xf32> to vector<8x8xf32>
    %62 = arith.mulf %57, %61 : vector<8x8xf32>
    %cst_30 = arith.constant dense<0.000000e+00> : vector<8x32xf32>
    %63 = tpu.matmul %62, %51, %cst_30 {dimension_numbers = #tpu.dot_dimension_numbers<[1], [0], [0], [1], [0, 0, 1, 1], [], []>} : vector<8x8xf32>, vector<8x32xf32>, vector<8x32xf32> -> vector<8x32xf32>
    %cst_31 = arith.constant dense<0.000000e+00> : vector<8x32xf32>
    %64 = tpu.matmul %63, %1, %cst_31 {dimension_numbers = #tpu.dot_dimension_numbers<[1], [0], [0], [1], [0, 0, 1, 1], [], []>} : vector<8x32xf32>, vector<32x32xf32>, vector<8x32xf32> -> vector<8x32xf32>
    %65 = vector.broadcast %5 : vector<1x32xf32> to vector<8x32xf32>
    %66 = arith.addf %64, %65 : vector<8x32xf32>
    %cst_32 = arith.constant dense<0.000000e+00> : vector<8x64xf32>
    %67 = tpu.matmul %45, %2, %cst_32 {dimension_numbers = #tpu.dot_dimension_numbers<[1], [0], [0], [1], [0, 0, 1, 1], [], []>} : vector<8x32xf32>, vector<32x64xf32>, vector<8x64xf32> -> vector<8x64xf32>
    %cst_33 = arith.constant dense<0.000000e+00> : vector<8x64xf32>
    %68 = tpu.matmul %66, %3, %cst_33 {dimension_numbers = #tpu.dot_dimension_numbers<[1], [0], [0], [1], [0, 0, 1, 1], [], []>} : vector<8x32xf32>, vector<32x64xf32>, vector<8x64xf32> -> vector<8x64xf32>
    %69 = arith.addf %67, %68 : vector<8x64xf32>
    %70 = vector.broadcast %6 : vector<1x64xf32> to vector<8x64xf32>
    %71 = arith.addf %69, %70 : vector<8x64xf32>
    %72 = vector.extract_strided_slice %71 {offsets = [0, 0], sizes = [8, 32], strides = [1, 1]} : vector<8x64xf32> to vector<8x32xf32>
    %73 = arith.negf %72 : vector<8x32xf32>
    %74 = math.exp %73 : vector<8x32xf32>
    %cst_34 = arith.constant 1.000000e+00 : f32
    %75 = vector.broadcast %cst_34 : f32 to vector<8x32xf32>
    %76 = arith.addf %75, %74 : vector<8x32xf32>
    %77 = arith.divf %75, %76 : vector<8x32xf32>
    %78 = vector.extract_strided_slice %71 {offsets = [0, 32], sizes = [8, 32], strides = [1, 1]} : vector<8x64xf32> to vector<8x32xf32>
    %79 = arith.subf %45, %78 : vector<8x32xf32>
    %80 = arith.mulf %77, %79 : vector<8x32xf32>
    %81 = arith.addf %78, %80 : vector<8x32xf32>
    %c0_35 = arith.constant 0 : index
    %c32_36 = arith.constant 32 : index
    %82 = vector.load %arg9[%c0_35, %c32_36] : memref<8x64xf32, #tpu.memory_space<vmem>>, vector<8x32xf32>
    tpu.vector_store %arg9[%c0_35, %c32_36], %81 {strides = array<i32>} : memref<8x64xf32, #tpu.memory_space<vmem>>, vector<8x32xf32>,
    return
  }
  func.func @transform_0(%arg0: i32) -> (i32, i32) {
    %c0_i32 = arith.constant 0 : i32
    %c0_i32_0 = arith.constant 0 : i32
    return %c0_i32, %arg0 : i32, i32
  }
  func.func @transform_1(%arg0: i32) -> (i32, i32) {
    %c0_i32 = arith.constant 0 : i32
    %c0_i32_0 = arith.constant 0 : i32
    %c0_i32_1 = arith.constant 0 : i32
    return %c0_i32, %c0_i32_0 : i32, i32
  }
  func.func @transform_2(%arg0: i32) -> (i32, i32) {
    %c0_i32 = arith.constant 0 : i32
    %c0_i32_0 = arith.constant 0 : i32
    %c0_i32_1 = arith.constant 0 : i32
    return %c0_i32, %c0_i32_0 : i32, i32
  }
  func.func @transform_3(%arg0: i32) -> (i32, i32) {
    %c0_i32 = arith.constant 0 : i32
    %c0_i32_0 = arith.constant 0 : i32
    %c0_i32_1 = arith.constant 0 : i32
    return %c0_i32, %c0_i32_0 : i32, i32
  }
  func.func @transform_4(%arg0: i32) -> (i32, i32) {
    %c0_i32 = arith.constant 0 : i32
    %c0_i32_0 = arith.constant 0 : i32
    %c0_i32_1 = arith.constant 0 : i32
    return %c0_i32, %c0_i32_0 : i32, i32
  }
  func.func @transform_5(%arg0: i32) -> (i32, i32) {
    %c0_i32 = arith.constant 0 : i32
    %c0_i32_0 = arith.constant 0 : i32
    %c0_i32_1 = arith.constant 0 : i32
    return %c0_i32, %c0_i32_0 : i32, i32
  }
  func.func @transform_6(%arg0: i32) -> (i32, i32) {
    %c0_i32 = arith.constant 0 : i32
    %c0_i32_0 = arith.constant 0 : i32
    %c0_i32_1 = arith.constant 0 : i32
    return %c0_i32, %c0_i32_0 : i32, i32
  }
  func.func @transform_7(%arg0: i32) -> (i32, i32) {
    %c0_i32 = arith.constant 0 : i32
    %c0_i32_0 = arith.constant 0 : i32
    %c0_i32_1 = arith.constant 0 : i32
    return %c0_i32, %c0_i32_0 : i32, i32
  }
  func.func @transform_8(%arg0: i32) -> (i32, i32) {
    %c0_i32 = arith.constant 0 : i32
    %c0_i32_0 = arith.constant 0 : i32
    return %c0_i32, %arg0 : i32, i32
  }
}

module attributes {stable_mosaic.version = 11 : i64} {
  func.func @kernel(%arg0: i32, %arg1: memref<8x64xf32, #tpu.memory_space<vmem>>, %arg2: memref<32x96xf32, #tpu.memory_space<vmem>>, %arg3: memref<1x96xf32, #tpu.memory_space<vmem>>, %arg4: memref<32x32xf32, #tpu.memory_space<vmem>>, %arg5: memref<1x32xf32, #tpu.memory_space<vmem>>, %arg6: memref<32x64xf32, #tpu.memory_space<vmem>>, %arg7: memref<32x64xf32, #tpu.memory_space<vmem>>, %arg8: memref<1x64xf32, #tpu.memory_space<vmem>>, %arg9: memref<8x64xf32, #tpu.memory_space<vmem>>) attributes {dimension_semantics = [#tpu.dimension_semantics<parallel>], iteration_bounds = array<i64: 1>, scalar_prefetch = 0 : i64, scratch_operands = 0 : i64, tpu.core_type = #tpu.core_type<tc>, window_params = [{transform_indices = @transform_0, window_bounds = array<i64: 8, 64>}, {pipeline_mode = #tpu.pipeline_mode<synchronous>, transform_indices = @transform_1, window_bounds = array<i64: 32, 96>}, {pipeline_mode = #tpu.pipeline_mode<synchronous>, transform_indices = @transform_2, window_bounds = array<i64: 1, 96>}, {pipeline_mode = #tpu.pipeline_mode<synchronous>, transform_indices = @transform_3, window_bounds = array<i64: 32, 32>}, {pipeline_mode = #tpu.pipeline_mode<synchronous>, transform_indices = @transform_4, window_bounds = array<i64: 1, 32>}, {pipeline_mode = #tpu.pipeline_mode<synchronous>, transform_indices = @transform_5, window_bounds = array<i64: 32, 64>}, {pipeline_mode = #tpu.pipeline_mode<synchronous>, transform_indices = @transform_6, window_bounds = array<i64: 32, 64>}, {pipeline_mode = #tpu.pipeline_mode<synchronous>, transform_indices = @transform_7, window_bounds = array<i64: 1, 64>}, {transform_indices = @transform_8, window_bounds = array<i64: 8, 64>}]} {
    %c0 = arith.constant 0 : index
    %c0_0 = arith.constant 0 : index
    %0 = vector.load %arg2[%c0, %c0_0] : memref<32x96xf32, #tpu.memory_space<vmem>>, vector<32x96xf32>
    %c0_1 = arith.constant 0 : index
    %c0_2 = arith.constant 0 : index
    %1 = vector.load %arg4[%c0_1, %c0_2] : memref<32x32xf32, #tpu.memory_space<vmem>>, vector<32x32xf32>
    %c0_3 = arith.constant 0 : index
    %c0_4 = arith.constant 0 : index
    %2 = vector.load %arg6[%c0_3, %c0_4] : memref<32x64xf32, #tpu.memory_space<vmem>>, vector<32x64xf32>
    %c0_5 = arith.constant 0 : index
    %c0_6 = arith.constant 0 : index
    %3 = vector.load %arg7[%c0_5, %c0_6] : memref<32x64xf32, #tpu.memory_space<vmem>>, vector<32x64xf32>
    %c0_7 = arith.constant 0 : index
    %c0_8 = arith.constant 0 : index
    %4 = vector.load %arg3[%c0_7, %c0_8] : memref<1x96xf32, #tpu.memory_space<vmem>>, vector<1x96xf32>
    %c0_9 = arith.constant 0 : index
    %c0_10 = arith.constant 0 : index
    %5 = vector.load %arg5[%c0_9, %c0_10] : memref<1x32xf32, #tpu.memory_space<vmem>>, vector<1x32xf32>
    %c0_11 = arith.constant 0 : index
    %c0_12 = arith.constant 0 : index
    %6 = vector.load %arg8[%c0_11, %c0_12] : memref<1x64xf32, #tpu.memory_space<vmem>>, vector<1x64xf32>
    %c0_13 = arith.constant 0 : index
    %c0_14 = arith.constant 0 : index
    %7 = vector.load %arg1[%c0_13, %c0_14] : memref<8x64xf32, #tpu.memory_space<vmem>>, vector<8x32xf32>
    %cst = arith.constant dense<0.000000e+00> : vector<8x96xf32>
    %8 = tpu.matmul %7, %0, %cst {dimension_numbers = #tpu.dot_dimension_numbers<[1], [0], [0], [1], [0, 0, 1, 1], [], []>} : vector<8x32xf32>, vector<32x96xf32>, vector<8x96xf32> -> vector<8x96xf32>
    %9 = vector.broadcast %4 : vector<1x96xf32> to vector<8x96xf32>
    %10 = arith.addf %8, %9 : vector<8x96xf32>
    %11 = vector.extract_strided_slice %10 {offsets = [0, 0], sizes = [8, 32], strides = [1, 1]} : vector<8x96xf32> to vector<8x32xf32>
    %12 = vector.extract_strided_slice %10 {offsets = [0, 32], sizes = [8, 32], strides = [1, 1]} : vector<8x96xf32> to vector<8x32xf32>
    %13 = vector.extract_strided_slice %10 {offsets = [0, 64], sizes = [8, 32], strides = [1, 1]} : vector<8x96xf32> to vector<8x32xf32>
    %cst_15 = arith.constant dense<0.000000e+00> : vector<8x8xf32>
    %14 = tpu.matmul %11, %12, %cst_15 {dimension_numbers = #tpu.dot_dimension_numbers<[1], [1], [0], [0], [0, 0, 1, 0], [], []>} : vector<8x32xf32>, vector<8x32xf32>, vector<8x8xf32> -> vector<8x8xf32>
    %cst_16 = arith.constant dense<0xFF800000> : vector<8xf32>
    %15 = vector.multi_reduction <maximumf>, %14, %cst_16 [1] : vector<8x8xf32> to vector<8xf32>
    %16 = vector.shape_cast %15 : vector<8xf32> to vector<8x1xf32>
    %17 = vector.broadcast %16 : vector<8x1xf32> to vector<8x8xf32>
    %18 = arith.subf %14, %17 : vector<8x8xf32>
    %19 = math.exp %18 : vector<8x8xf32>
    %cst_17 = arith.constant dense<0.000000e+00> : vector<8xf32>
    %20 = vector.multi_reduction <add>, %19, %cst_17 [1] : vector<8x8xf32> to vector<8xf32>
    %21 = vector.shape_cast %20 : vector<8xf32> to vector<8x1xf32>
    %22 = tpu.reciprocal %21 {approx = true} : vector<8x1xf32> -> vector<8x1xf32>
    %23 = vector.broadcast %22 : vector<8x1xf32> to vector<8x8xf32>
    %24 = arith.mulf %19, %23 : vector<8x8xf32>
    %cst_18 = arith.constant dense<0.000000e+00> : vector<8x32xf32>
    %25 = tpu.matmul %24, %13, %cst_18 {dimension_numbers = #tpu.dot_dimension_numbers<[1], [0], [0], [1], [0, 0, 1, 1], [], []>} : vector<8x8xf32>, vector<8x32xf32>, vector<8x32xf32> -> vector<8x32xf32>
    %cst_19 = arith.constant dense<0.000000e+00> : vector<8x32xf32>
    %26 = tpu.matmul %25, %1, %cst_19 {dimension_numbers = #tpu.dot_dimension_numbers<[1], [0], [0], [1], [0, 0, 1, 1], [], []>} : vector<8x32xf32>, vector<32x32xf32>, vector<8x32xf32> -> vector<8x32xf32>
    %27 = vector.broadcast %5 : vector<1x32xf32> to vector<8x32xf32>
    %28 = arith.addf %26, %27 : vector<8x32xf32>
    %cst_20 = arith.constant dense<0.000000e+00> : vector<8x64xf32>
    %29 = tpu.matmul %7, %2, %cst_20 {dimension_numbers = #tpu.dot_dimension_numbers<[1], [0], [0], [1], [0, 0, 1, 1], [], []>} : vector<8x32xf32>, vector<32x64xf32>, vector<8x64xf32> -> vector<8x64xf32>
    %cst_21 = arith.constant dense<0.000000e+00> : vector<8x64xf32>
    %30 = tpu.matmul %28, %3, %cst_21 {dimension_numbers = #tpu.dot_dimension_numbers<[1], [0], [0], [1], [0, 0, 1, 1], [], []>} : vector<8x32xf32>, vector<32x64xf32>, vector<8x64xf32> -> vector<8x64xf32>
    %31 = arith.addf %29, %30 : vector<8x64xf32>
    %32 = vector.broadcast %6 : vector<1x64xf32> to vector<8x64xf32>
    %33 = arith.addf %31, %32 : vector<8x64xf32>
    %34 = vector.extract_strided_slice %33 {offsets = [0, 0], sizes = [8, 32], strides = [1, 1]} : vector<8x64xf32> to vector<8x32xf32>
    %35 = arith.negf %34 : vector<8x32xf32>
    %36 = math.exp %35 : vector<8x32xf32>
    %cst_22 = arith.constant 1.000000e+00 : f32
    %37 = vector.broadcast %cst_22 : f32 to vector<8x32xf32>
    %38 = arith.addf %37, %36 : vector<8x32xf32>
    %39 = arith.divf %37, %38 : vector<8x32xf32>
    %40 = vector.extract_strided_slice %33 {offsets = [0, 32], sizes = [8, 32], strides = [1, 1]} : vector<8x64xf32> to vector<8x32xf32>
    %41 = arith.subf %7, %40 : vector<8x32xf32>
    %42 = arith.mulf %39, %41 : vector<8x32xf32>
    %43 = arith.addf %40, %42 : vector<8x32xf32>
    %c0_23 = arith.constant 0 : index
    %c0_24 = arith.constant 0 : index
    %44 = vector.load %arg9[%c0_23, %c0_24] : memref<8x64xf32, #tpu.memory_space<vmem>>, vector<8x32xf32>
    tpu.vector_store %arg9[%c0_23, %c0_24], %43 {strides = array<i32>} : memref<8x64xf32, #tpu.memory_space<vmem>>, vector<8x32xf32>,
    %c0_25 = arith.constant 0 : index
    %c32 = arith.constant 32 : index
    %45 = vector.load %arg1[%c0_25, %c32] : memref<8x64xf32, #tpu.memory_space<vmem>>, vector<8x32xf32>
    %cst_26 = arith.constant dense<0.000000e+00> : vector<8x96xf32>
    %46 = tpu.matmul %45, %0, %cst_26 {dimension_numbers = #tpu.dot_dimension_numbers<[1], [0], [0], [1], [0, 0, 1, 1], [], []>} : vector<8x32xf32>, vector<32x96xf32>, vector<8x96xf32> -> vector<8x96xf32>
    %47 = vector.broadcast %4 : vector<1x96xf32> to vector<8x96xf32>
    %48 = arith.addf %46, %47 : vector<8x96xf32>
    %49 = vector.extract_strided_slice %48 {offsets = [0, 0], sizes = [8, 32], strides = [1, 1]} : vector<8x96xf32> to vector<8x32xf32>
    %50 = vector.extract_strided_slice %48 {offsets = [0, 32], sizes = [8, 32], strides = [1, 1]} : vector<8x96xf32> to vector<8x32xf32>
    %51 = vector.extract_strided_slice %48 {offsets = [0, 64], sizes = [8, 32], strides = [1, 1]} : vector<8x96xf32> to vector<8x32xf32>
    %cst_27 = arith.constant dense<0.000000e+00> : vector<8x8xf32>
    %52 = tpu.matmul %49, %50, %cst_27 {dimension_numbers = #tpu.dot_dimension_numbers<[1], [1], [0], [0], [0, 0, 1, 0], [], []>} : vector<8x32xf32>, vector<8x32xf32>, vector<8x8xf32> -> vector<8x8xf32>
    %cst_28 = arith.constant dense<0xFF800000> : vector<8xf32>
    %53 = vector.multi_reduction <maximumf>, %52, %cst_28 [1] : vector<8x8xf32> to vector<8xf32>
    %54 = vector.shape_cast %53 : vector<8xf32> to vector<8x1xf32>
    %55 = vector.broadcast %54 : vector<8x1xf32> to vector<8x8xf32>
    %56 = arith.subf %52, %55 : vector<8x8xf32>
    %57 = math.exp %56 : vector<8x8xf32>
    %cst_29 = arith.constant dense<0.000000e+00> : vector<8xf32>
    %58 = vector.multi_reduction <add>, %57, %cst_29 [1] : vector<8x8xf32> to vector<8xf32>
    %59 = vector.shape_cast %58 : vector<8xf32> to vector<8x1xf32>
    %60 = tpu.reciprocal %59 {approx = true} : vector<8x1xf32> -> vector<8x1xf32>
    %61 = vector.broadcast %60 : vector<8x1xf32> to vector<8x8xf32>
    %62 = arith.mulf %57, %61 : vector<8x8xf32>
    %cst_30 = arith.constant dense<0.000000e+00> : vector<8x32xf32>
    %63 = tpu.matmul %62, %51, %cst_30 {dimension_numbers = #tpu.dot_dimension_numbers<[1], [0], [0], [1], [0, 0, 1, 1], [], []>} : vector<8x8xf32>, vector<8x32xf32>, vector<8x32xf32> -> vector<8x32xf32>
    %cst_31 = arith.constant dense<0.000000e+00> : vector<8x32xf32>
    %64 = tpu.matmul %63, %1, %cst_31 {dimension_numbers = #tpu.dot_dimension_numbers<[1], [0], [0], [1], [0, 0, 1, 1], [], []>} : vector<8x32xf32>, vector<32x32xf32>, vector<8x32xf32> -> vector<8x32xf32>
    %65 = vector.broadcast %5 : vector<1x32xf32> to vector<8x32xf32>
    %66 = arith.addf %64, %65 : vector<8x32xf32>
    %cst_32 = arith.constant dense<0.000000e+00> : vector<8x64xf32>
    %67 = tpu.matmul %45, %2, %cst_32 {dimension_numbers = #tpu.dot_dimension_numbers<[1], [0], [0], [1], [0, 0, 1, 1], [], []>} : vector<8x32xf32>, vector<32x64xf32>, vector<8x64xf32> -> vector<8x64xf32>
    %cst_33 = arith.constant dense<0.000000e+00> : vector<8x64xf32>
    %68 = tpu.matmul %66, %3, %cst_33 {dimension_numbers = #tpu.dot_dimension_numbers<[1], [0], [0], [1], [0, 0, 1, 1], [], []>} : vector<8x32xf32>, vector<32x64xf32>, vector<8x64xf32> -> vector<8x64xf32>
    %69 = arith.addf %67, %68 : vector<8x64xf32>
    %70 = vector.broadcast %6 : vector<1x64xf32> to vector<8x64xf32>
    %71 = arith.addf %69, %70 : vector<8x64xf32>
    %72 = vector.extract_strided_slice %71 {offsets = [0, 0], sizes = [8, 32], strides = [1, 1]} : vector<8x64xf32> to vector<8x32xf32>
    %73 = arith.negf %72 : vector<8x32xf32>
    %74 = math.exp %73 : vector<8x32xf32>
    %cst_34 = arith.constant 1.000000e+00 : f32
    %75 = vector.broadcast %cst_34 : f32 to vector<8x32xf32>
    %76 = arith.addf %75, %74 : vector<8x32xf32>
    %77 = arith.divf %75, %76 : vector<8x32xf32>
    %78 = vector.extract_strided_slice %71 {offsets = [0, 32], sizes = [8, 32], strides = [1, 1]} : vector<8x64xf32> to vector<8x32xf32>
    %79 = arith.subf %45, %78 : vector<8x32xf32>
    %80 = arith.mulf %77, %79 : vector<8x32xf32>
    %81 = arith.addf %78, %80 : vector<8x32xf32>
    %c0_35 = arith.constant 0 : index
    %c32_36 = arith.constant 32 : index
    %82 = vector.load %arg9[%c0_35, %c32_36] : memref<8x64xf32, #tpu.memory_space<vmem>>, vector<8x32xf32>
    tpu.vector_store %arg9[%c0_35, %c32_36], %81 {strides = array<i32>} : memref<8x64xf32, #tpu.memory_space<vmem>>, vector<8x32xf32>,
    return
  }
  func.func @transform_0(%arg0: i32) -> (i32, i32) {
    %c0_i32 = arith.constant 0 : i32
    %c0_i32_0 = arith.constant 0 : i32
    return %c0_i32, %arg0 : i32, i32
  }
  func.func @transform_1(%arg0: i32) -> (i32, i32) {
    %c0_i32 = arith.constant 0 : i32
    %c0_i32_0 = arith.constant 0 : i32
    %c0_i32_1 = arith.constant 0 : i32
    return %c0_i32, %c0_i32_0 : i32, i32
  }
  func.func @transform_2(%arg0: i32) -> (i32, i32) {
    %c0_i32 = arith.constant 0 : i32
    %c0_i32_0 = arith.constant 0 : i32
    %c0_i32_1 = arith.constant 0 : i32
    return %c0_i32, %c0_i32_0 : i32, i32
  }
  func.func @transform_3(%arg0: i32) -> (i32, i32) {
    %c0_i32 = arith.constant 0 : i32
    %c0_i32_0 = arith.constant 0 : i32
    %c0_i32_1 = arith.constant 0 : i32
    return %c0_i32, %c0_i32_0 : i32, i32
  }
  func.func @transform_4(%arg0: i32) -> (i32, i32) {
    %c0_i32 = arith.constant 0 : i32
    %c0_i32_0 = arith.constant 0 : i32
    %c0_i32_1 = arith.constant 0 : i32
    return %c0_i32, %c0_i32_0 : i32, i32
  }
  func.func @transform_5(%arg0: i32) -> (i32, i32) {
    %c0_i32 = arith.constant 0 : i32
    %c0_i32_0 = arith.constant 0 : i32
    %c0_i32_1 = arith.constant 0 : i32
    return %c0_i32, %c0_i32_0 : i32, i32
  }
  func.func @transform_6(%arg0: i32) -> (i32, i32) {
    %c0_i32 = arith.constant 0 : i32
    %c0_i32_0 = arith.constant 0 : i32
    %c0_i32_1 = arith.constant 0 : i32
    return %c0_i32, %c0_i32_0 : i32, i32
  }
  func.func @transform_7(%arg0: i32) -> (i32, i32) {
    %c0_i32 = arith.constant 0 : i32
    %c0_i32_0 = arith.constant 0 : i32
    %c0_i32_1 = arith.constant 0 : i32
    return %c0_i32, %c0_i32_0 : i32, i32
  }
  func.func @transform_8(%arg0: i32) -> (i32, i32) {
    %c0_i32 = arith.constant 0 : i32
    %c0_i32_0 = arith.constant 0 : i32
    return %c0_i32, %arg0 : i32, i32
  }
}

</mosaic_0001>

<bundles_post_ra>
// kernel: tpu_custom_call.1
= control target key start
LH: loop header
LB: loop body
LE: loop exit
PB: predicated region body
PF: predicated region fallthrough
CT: control target
= control target key end

     0   :  { %13 = vsyncpa [#allocation3], 0  ;;  %s1695_s0 = inlined_call_operand.hbm [shape: f32[8,64], index: 0, kind: input, shape index: {}]   ;;  %s1696_s1 = inlined_call_operand.hbm [shape: f32[32,96], index: 1, kind: input, shape index: {}]   ;;  %s1697_s2 = inlined_call_operand.vmem [shape: f32[1,96], index: 2, kind: input, shape index: {}]   ;;  %s1698_s3 = inlined_call_operand.hbm [shape: f32[32,32], index: 3, kind: input, shape index: {}]   ;;  %s1699_s4 = inlined_call_operand.vmem [shape: f32[1,32], index: 4, kind: input, shape index: {}]   ;;  %s1700_s5 = inlined_call_operand.hbm [shape: f32[32,64], index: 5, kind: input, shape index: {}]   ;;  %s1701_s6 = inlined_call_operand.hbm [shape: f32[32,64], index: 6, kind: input, shape index: {}]   ;;  %s1702_s7 = inlined_call_operand.vmem [shape: f32[1,64], index: 7, kind: input, shape index: {}]   ;;  %s1703_s8 = inlined_call_operand.hbm [shape: f32[8,64], index: 8, kind: output, shape index: {}]  }
   0x1   :  { %14 = vsyncpa [#allocation6], 0 }
   0x2   :  { %15 = vsyncpa [#allocation9], 0 }
   0x3   :  { %16 = vsyncpa [#allocation4], 0  ;;  %s1437_s27 = smov [#allocation5]  }
   0x4   :  { %s32_s28 = sshll.u32 %s1437_s27, 4  ;;  %s33_s28 = int_to_ptr.vmem [resolvable:$true] %s32_s28 }
   0x5   :  { %s1317_s29 = scalar_lea.vmem %s33_s28, 512  ;;  %p1322_p1 = scmp.lt.s32.totalorder %s33_s28, %s33_s28 }
   0x6   :  { %p1318_p0 = scmp.ne.s32.totalorder %s33_s28, %s1317_s29  ;;  %p1323_p2 = scmp.lt.s32.totalorder %s1317_s29, %s1317_s29 }
   0x8   :  { %p1324_p3 = por %p1323_p2, %p1322_p1 }
   0xa   :  { %p1325_p4 = pnand %p1324_p3, %p1318_p0 }
   0xc   :  { %1328 = shalt.err (!%p1325_p4)
}
   0xd   :  { %s1438_s30 = smov 128   ;;  %s1439_s9 = smov 8  }
   0xe   :  { %38 = dma.hbm_to_vmem [thread:$0]  %s1696_s1, 512, %s33_s28, [#allocation6], %s1438_s30, %s1438_s30, %s1439_s9  }
   0xf   :  { %s1440_s12 = smov [#allocation8]   ;;  %s1441_s14 = smov [#allocation2]  }
  0x10   :  { %s60_s13 = sshll.u32 %s1440_s12, 4  ;;  %s23_s15 = sshll.u32 %s1441_s14, 4  ;;  %s61_s13 = int_to_ptr.vmem [resolvable:$true] %s60_s13  ;;  %s24_s15 = int_to_ptr.vmem [resolvable:$true] %s23_s15 }
  0x11   :  { %s1337_s16 = scalar_lea.vmem %s61_s13, 512  ;;  %p1342_p6 = scmp.lt.s32.totalorder %s61_s13, %s61_s13 }
  0x12   :  { %p1338_p5 = scmp.ne.s32.totalorder %s61_s13, %s1337_s16  ;;  %p1343_p7 = scmp.lt.s32.totalorder %s1337_s16, %s1337_s16 }
  0x14   :  { %p1344_p8 = por %p1343_p7, %p1342_p6 }
  0x16   :  { %p1345_p9 = pnand %p1344_p8, %p1338_p5 }
  0x18   :  { %1348 = shalt.err (!%p1345_p9)
}
  0x19   :  { %66 = dma.hbm_to_vmem [thread:$0]  %s1700_s5, 512, %s61_s13, [#allocation9], %s1438_s30, %s1438_s30, %s1439_s9  }
  0x1a   :  { %s1357_s1 = scalar_lea.vmem %s24_s15, 128  ;;  %p1362_p11 = scmp.lt.s32.totalorder %s24_s15, %s24_s15 }
  0x1b   :  { %p1358_p10 = scmp.ne.s32.totalorder %s24_s15, %s1357_s1  ;;  %p1363_p12 = scmp.lt.s32.totalorder %s1357_s1, %s1357_s1 }
  0x1d   :  { %p1364_p13 = por %p1363_p12, %p1362_p11 }
  0x1f   :  { %p1365_p0 = pnand %p1364_p13, %p1358_p10 }
  0x21   :  { %1368 = shalt.err (!%p1365_p0)
}
  0x22   :  { %26 = dma.hbm_to_vmem [thread:$0]  %s1695_s0, 128, %s24_s15, [#allocation3]  }
  0x23   :  { %s1442_s21 = smov [#allocation7]   ;;  %s1443_s23 = smov [#allocation10]  }
  0x24   :  { %s46_s22 = sshll.u32 %s1442_s21, 4  ;;  %s72_s24 = sshll.u32 %s1443_s23, 4  ;;  %s47_s22 = int_to_ptr.vmem [resolvable:$true] %s46_s22  ;;  %s73_s24 = int_to_ptr.vmem [resolvable:$true] %s72_s24 }
  0x25   :  { %s1377_s25 = scalar_lea.vmem %s47_s22, 512  ;;  %p1382_p2 = scmp.lt.s32.totalorder %s47_s22, %s47_s22 }
  0x26   :  { %p1378_p1 = scmp.ne.s32.totalorder %s47_s22, %s1377_s25  ;;  %p1383_p3 = scmp.lt.s32.totalorder %s1377_s25, %s1377_s25 }
  0x28   :  { %p1384_p4 = por %p1383_p3, %p1382_p2 }
  0x2a   :  { %p1385_p5 = pnand %p1384_p4, %p1378_p1 }
  0x2c   :  { %1388 = shalt.err (!%p1385_p5)
}
  0x2d   :  { %52 = dma.hbm_to_vmem [thread:$0]  %s1698_s3, 512, %s47_s22, [#allocation6], %s1438_s30, %s1438_s30, %s1439_s9  }
  0x2e   :  { %s1397_s0 = scalar_lea.vmem %s73_s24, 512  ;;  %p1402_p7 = scmp.lt.s32.totalorder %s73_s24, %s73_s24 }
  0x2f   :  { %p1398_p6 = scmp.ne.s32.totalorder %s73_s24, %s1397_s0  ;;  %p1403_p8 = scmp.lt.s32.totalorder %s1397_s0, %s1397_s0 }
  0x31   :  { %p1404_p9 = por %p1403_p8, %p1402_p7 }
  0x33   :  { %p1405_p10 = pnand %p1404_p9, %p1398_p6 }
  0x35   :  { %1408 = shalt.err (!%p1405_p10)
}
  0x36   :  { %78 = dma.hbm_to_vmem [thread:$0]  %s1701_s6, 512, %s73_s24, [#allocation9], %s1438_s30, %s1438_s30, %s1439_s9  }
  0x37   :  { %1429 = dma.done.wait [#allocation3], 128  }
  0x38   :  { %1430 = vsyncadd [#allocation3], 4294967168 }
  0x39   :  { %1431 = dma.done.wait [#allocation6], 1024  }
  0x3a   :  { %1432 = vsyncadd [#allocation6], 4294966272 }
  0x3b   :  { %1433 = dma.done.wait [#allocation9], 1024  }
  0x3c   :  { %1434 = vsyncadd [#allocation9], 4294966272  ;;  %v1444_v0 = vmov 0.0   ;;  %vm1445_vm0 = vmmov 0   ;;  %v1528_v1 = vld [vmem:[#allocation5 + $0x18] sm:$0xff]  ;;  %v1530_v2 = vld [vmem:[#allocation5 + $0x10] sm:$0xff] }
  0x3d   :  { %1172 = vmatprep.subr.mxu0 %v1444_v0  ;;  %1180 = vmatprep.mubr.msk.f32.mxu0 %vm1445_vm0, %v1444_v0  ;;  %v1534_v3 = vld [vmem:[#allocation5 + $0x8] sm:$0xff]  ;;  %v1538_v4 = vld [vmem:[#allocation5] sm:$0xff]  ;;  %v1541_v5 = vld [vmem:[#allocation2] sm:$0xff]  ;;  %vm122_vm1 = vcmask 261120   ;;  %s1446_s29 = smov 96   ;;  %vm273_vm2 = vcmask 64512  }
  0x3e   :  { %1183 = vmatprep.subr.mxu1 %v1444_v0  ;;  %1185 = vmatprep.mubr.msk.f32.mxu1 %vm1445_vm0, %v1444_v0  ;;  %v1553_v6 = vld [vmem:[%s1697_s2] ss:$0 sm:$0xff]  ;;  %s1447_s2 = smov 64   ;;  %v102_v20 = vld [vmem:[#allocation7 + $0x10] sm:$0xff]  ;;  %v101_v21 = vld [vmem:[#allocation7 + $0x8] sm:$0xff]  ;;  %s1449_s11 = smov [#allocation11]  }
  0x3f   :  { %1173 = vmatpush3.msra.mxu0 %v1528_v1  ;;  %v103_v19 = vld [vmem:[#allocation7 + $0x18] sm:$0xff]  ;;  %v100_v26 = vld [vmem:[#allocation7] sm:$0xff]  ;;  %v1577_v28 = vld [vmem:[#allocation10 + $0x10] sm:$0xff]  ;;  %s1094_s12 = sshll.u32 %s1449_s11, 4  ;;  %vm1086_vm3 = vcmask 523520   ;;  %s1095_s12 = int_to_ptr.vmem [resolvable:$true] %s1094_s12 }
  0x40   :  { %1174 = vmatprep.subr.mxu0 %v1444_v0  ;;  %v1575_v27 = vld [vmem:[#allocation10 + $0x18] sm:$0xff]  ;;  %v1581_v29 = vld [vmem:[#allocation10 + $0x8] sm:$0xff]  ;;  %v1590_v32 = vld [vmem:[#allocation8 + $0x10] sm:$0xff]  ;;  %s1409_s13 = scalar_lea.vmem %s1095_s12, 128  ;;  %p1414_p12 = scmp.lt.s32.totalorder %s1095_s12, %s1095_s12 }
  0x41   :  { %1175 = vmatpush3.msra.mxu0 %v1530_v2  ;;  %v1587_v30 = vld [vmem:[#allocation8 + $0x18] sm:$0xff]  ;;  %v1598_v34 = vld [vmem:[#allocation8 + $0x8] sm:$0xff]  ;;  %v1601_v35 = vld [vmem:[#allocation10] sm:$0xff]  ;;  %p1410_p11 = scmp.ne.s32.totalorder %s1095_s12, %s1409_s13  ;;  %p1415_p13 = scmp.lt.s32.totalorder %s1409_s13, %s1409_s13 }
  0x42   :  { %1176 = vmatprep.subr.mxu0 %v1444_v0  ;;  %v1605_v36 = vld [vmem:[#allocation8] sm:$0xff]  ;;  %v1621_v37 = vld [vmem:[%s1699_s4] ss:$0 sm:$0xff] }
  0x43   :  { %1177 = vmatpush3.msra.mxu0 %v1534_v3  ;;  %v1114_v59 = vld [vmem:[%s1702_s7] ss:$0 sm:$0xff]  ;;  %s1448_s7 = smov 32   ;;  %p1416_p0 = por %p1415_p13, %p1414_p12 }
  0x44   :  { %1178 = vmatprep.subr.mxu0 %v1444_v0 }
  0x45   :  { %1179 = vmatpush3.msra.mxu0 %v1538_v4  ;;  %p1417_p1 = pnand %p1416_p0, %p1410_p11 }
  0x46   :  { %1181 = vmatmul.mubr.msk.f32.vlgmr.msra.gmra.mxu0 %vm122_vm1, %v1541_v5  ;;  %1193 = vmatprep.subr.mxu0 %v1444_v0 }
  0x47   :  { %1201 = vmatprep.mubr.msk.f32.mxu0 %vm1445_vm0, %v1444_v0  ;;  %1194 = vmatpush3.msra.mxu0 %v103_v19 }
  0x48   :  { %1195 = vmatprep.subr.mxu0 %v1444_v0 }
  0x49   :  { %1196 = vmatpush3.msra.mxu0 %v102_v20 }
  0x4a   :  { %1197 = vmatprep.subr.mxu0 %v1444_v0 }
  0x4b   :  { %1198 = vmatpush3.msra.mxu0 %v101_v21 }
  0x4c   :  { %1199 = vmatprep.subr.mxu0 %v1444_v0 }
  0x4d   :  { %1200 = vmatpush3.msra.mxu0 %v100_v26 }
  0x4e   :  { %1215 = vmatprep.subr.mxu0 %v1444_v0 }
 0x106   :  { %v192_v7 = vpop.f32.mrf.mxu0 }
 0x107   :  { %v193_v8 = vadd.f32 %v1553_v6, %v192_v7 }
 0x108   :  { %v1182_v9 = vpop.f32.mrf.mxu0 }
 0x109   :  { %197 = vrot.lane.b32.xlu0 %v193_v8, %s1446_s29 }
 0x17b   :  { %v198_v10 = vpop.permute.xlu0 %197 }
 0x17c   :  { %1184 = vmatpush3.xpose.msk.msra.mxu1 %vm122_vm1, %v198_v10 }
 0x17d   :  { %1188 = vmatprep.subr.mxu1 %v1444_v0 }
 0x17f   :  { %1186 = vmatmul.mubr.msk.f32.vlgmr.msra.gmra.mxu1 %vm122_vm1, %v193_v8 }
 0x180   :  { %1190 = vmatprep.mubr.msk.f32.mxu1 %vm1445_vm0, %v1444_v0 }
 0x23f   :  { %v269_v11 = vpop.f32.mrf.mxu1 }
 0x240   :  { %v274_v12 = vsel %vm273_vm2, %v269_v11, -inf }
 0x241   :  { %275 = vmax.xlane.f32.xlu0 %v274_v12  ;;  %v1187_v13 = vpop.f32.mrf.mxu1 }
 0x2ca   :  { %v276_v14 = vpop.xlane.xlu0 %275 }
 0x2cb   :  { %v277_v15 = vsub.f32 %v269_v11, %v276_v14 }
 0x2cd   :  { %v278_v16 = vmul.f32 1.442695, %v277_v15 }
 0x2cf   :  { %1293 = vpow2.f32 %v278_v16 }
 0x2dc   :  { %v1294_v17 = vpop.eup %1293 }
 0x2dd   :  { %v280_v18 = vsel %vm273_vm2, %v1294_v17, 0.0 }
 0x2de   :  { %281 = vadd.xlane.f32.xlu1 %v280_v18 }
 0x2ef   :  { %285 = vrot.lane.b32.xlu1 %v193_v8, %s1447_s2 }
 0x2f3   :  { %614 = vrot.lane.b32.xlu1 %v1541_v5, %s1446_s29 }
 0x367   :  { %v282_v22 = vpop.xlane.xlu1 %281 }
 0x368   :  { %1295 = vrcp.f32 %v282_v22 }
 0x36b   :  { %v286_v23 = vpop.permute.xlu1 %285 }
 0x36c   :  { %1189 = vmatpush3.msra.mxu1 %v286_v23 }
 0x36d   :  { %1204 = vmatprep.subr.mxu1 %v1444_v0 }
 0x36f   :  { %v1632_v41 = vpop.permute.xlu1 %614 }
 0x375   :  { %v1296_v24 = vpop.eup %1295 }
 0x376   :  { %v284_v25 = vmul.f32 %v1296_v24, %v1294_v17 }
 0x378   :  { %1191 = vmatmul.mubr.msk.f32.vlgmr.msra.gmra.mxu1 %vm273_vm2, %v284_v25 }
 0x379   :  { %1212 = vmatprep.mubr.msk.f32.mxu1 %vm1445_vm0, %v1444_v0  ;;  %1205 = vmatpush3.msra.mxu1 %v1575_v27 }
 0x37a   :  { %1206 = vmatprep.subr.mxu1 %v1444_v0 }
 0x37b   :  { %1207 = vmatpush3.msra.mxu1 %v1577_v28 }
 0x37c   :  { %1208 = vmatprep.subr.mxu1 %v1444_v0 }
 0x37d   :  { %1209 = vmatpush3.msra.mxu1 %v1581_v29 }
 0x37e   :  { %1210 = vmatprep.subr.mxu1 %v1444_v0 }
 0x37f   :  { %1211 = vmatpush3.msra.mxu1 %v1601_v35 }
 0x380   :  { %1226 = vmatprep.subr.mxu1 %v1444_v0 }
 0x438   :  { %v357_v31 = vpop.f32.mrf.mxu1 }
 0x439   :  { %1202 = vmatmul.mubr.msk.f32.vlgmr.msra.gmra.mxu0 %vm122_vm1, %v357_v31 }
 0x43a   :  { %v1192_v33 = vpop.f32.mrf.mxu1  ;;  %1216 = vmatpush3.msra.mxu0 %v1587_v30  ;;  %1223 = vmatprep.mubr.msk.f32.mxu0 %vm1445_vm0, %v1444_v0 }
 0x43b   :  { %1217 = vmatprep.subr.mxu0 %v1444_v0 }
 0x43c   :  { %1218 = vmatpush3.msra.mxu0 %v1590_v32 }
 0x43d   :  { %1219 = vmatprep.subr.mxu0 %v1444_v0 }
 0x43e   :  { %1220 = vmatpush3.msra.mxu0 %v1598_v34 }
 0x43f   :  { %1221 = vmatprep.subr.mxu0 %v1444_v0 }
 0x440   :  { %1222 = vmatpush3.msra.mxu0 %v1605_v36 }
 0x441   :  { %1224 = vmatmul.mubr.msk.f32.vlgmr.msra.gmra.mxu0 %vm122_vm1, %v1541_v5  ;;  %1247 = vmatprep.subr.mxu0 %v1444_v0 }
 0x442   :  { %1248 = vmatpush3.msra.mxu0 %v103_v19  ;;  %1255 = vmatprep.mubr.msk.f32.mxu0 %vm1445_vm0, %v1444_v0 }
 0x443   :  { %1249 = vmatprep.subr.mxu0 %v1444_v0 }
 0x444   :  { %1250 = vmatpush3.msra.mxu0 %v102_v20 }
 0x445   :  { %1251 = vmatprep.subr.mxu0 %v1444_v0 }
 0x446   :  { %1252 = vmatpush3.msra.mxu0 %v101_v21 }
 0x447   :  { %1253 = vmatprep.subr.mxu0 %v1444_v0 }
 0x448   :  { %1254 = vmatpush3.msra.mxu0 %v100_v26 }
 0x449   :  { %1269 = vmatprep.subr.mxu0 %v1444_v0 }
 0x4f9   :  { %v436_v38 = vpop.f32.mrf.mxu0 }
 0x4fa   :  { %v437_v39 = vadd.f32 %v1621_v37, %v436_v38 }
 0x4fb   :  { %v1203_v40 = vpop.f32.mrf.mxu0 }
 0x4fc   :  { %1213 = vmatmul.mubr.msk.f32.vlgmr.msra.gmra.mxu1 %vm122_vm1, %v437_v39 }
 0x4fd   :  { %1227 = vmatpush3.msra.mxu1 %v1528_v1  ;;  %1234 = vmatprep.mubr.msk.f32.mxu1 %vm1445_vm0, %v1444_v0 }
 0x4fe   :  { %1228 = vmatprep.subr.mxu1 %v1444_v0 }
 0x4ff   :  { %1229 = vmatpush3.msra.mxu1 %v1530_v2 }
 0x500   :  { %1230 = vmatprep.subr.mxu1 %v1444_v0 }
 0x501   :  { %1231 = vmatpush3.msra.mxu1 %v1534_v3  ;;  %v579_v42 = vpop.f32.mrf.mxu0 }
 0x502   :  { %1232 = vmatprep.subr.mxu1 %v1444_v0 }
 0x503   :  { %1233 = vmatpush3.msra.mxu1 %v1538_v4  ;;  %v1225_v43 = vpop.f32.mrf.mxu0 }
 0x504   :  { %1235 = vmatmul.mubr.msk.f32.vlgmr.msra.gmra.mxu1 %vm122_vm1, %v1632_v41  ;;  %1237 = vmatprep.subr.mxu1 %v1444_v0 }
 0x505   :  { %1239 = vmatprep.mubr.msk.f32.mxu1 %vm1445_vm0, %v1444_v0 }
 0x5bc   :  { %v509_v44 = vpop.f32.mrf.mxu1 }
 0x5bd   :  { %v580_v58 = vadd.f32 %v579_v42, %v509_v44 }
 0x5be   :  { %v1214_v45 = vpop.f32.mrf.mxu1 }
 0x5bf   :  { %v1654_v60 = vadd.f32 %v1114_v59, %v580_v58 }
 0x5c1   :  { %v1115_v61 = vmul.f32 -1.442695, %v1654_v60 }
 0x5c4   :  { %v684_v46 = vpop.f32.mrf.mxu1 }
 0x5c5   :  { %v685_v47 = vadd.f32 %v1553_v6, %v684_v46 }
 0x5c6   :  { %v1236_v48 = vpop.f32.mrf.mxu1 }
 0x5c7   :  { %689 = vrot.lane.b32.xlu1 %v685_v47, %s1446_s29 }
 0x639   :  { %v690_v49 = vpop.permute.xlu1 %689 }
 0x63a   :  { %1238 = vmatpush3.xpose.msk.msra.mxu1 %vm122_vm1, %v690_v49 }
 0x63b   :  { %1242 = vmatprep.subr.mxu1 %v1444_v0 }
 0x63d   :  { %1240 = vmatmul.mubr.msk.f32.vlgmr.msra.gmra.mxu1 %vm122_vm1, %v685_v47 }
 0x63e   :  { %1244 = vmatprep.mubr.msk.f32.mxu1 %vm1445_vm0, %v1444_v0 }
 0x6fd   :  { %v761_v50 = vpop.f32.mrf.mxu1 }
 0x6fe   :  { %v765_v51 = vsel %vm273_vm2, %v761_v50, -inf }
 0x6ff   :  { %766 = vmax.xlane.f32.xlu1 %v765_v51  ;;  %v1241_v52 = vpop.f32.mrf.mxu1 }
 0x788   :  { %v767_v53 = vpop.xlane.xlu1 %766 }
 0x789   :  { %v768_v54 = vsub.f32 %v761_v50, %v767_v53 }
 0x78b   :  { %v769_v55 = vmul.f32 1.442695, %v768_v54 }
 0x78d   :  { %1297 = vpow2.f32 %v769_v55 }
 0x78e   :  { %1299 = vpow2.f32 %v1115_v61 }
 0x79a   :  { %v1298_v56 = vpop.eup %1297 }
 0x79b   :  { %v771_v57 = vsel %vm273_vm2, %v1298_v56, 0.0  ;;  %v1300_v62 = vpop.eup %1299 }
 0x79c   :  { %772 = vadd.xlane.f32.xlu0 %v771_v57  ;;  %v593_v63 = vadd.f32 1.0, %v1300_v62 }
 0x79e   :  { %1301 = vrcp.f32 %v593_v63 }
 0x7ab   :  { %v1302_v6 = vpop.eup %1301 }
 0x7b2   :  { %776 = vrot.lane.b32.xlu0 %v685_v47, %s1447_s2 }
 0x7b6   :  { %597 = vrot.lane.b32.xlu0 %v1654_v60, %s1446_s29 }
 0x825   :  { %v773_v1 = vpop.xlane.xlu0 %772 }
 0x826   :  { %1303 = vrcp.f32 %v773_v1 }
 0x829   :  { %v777_v2 = vpop.permute.xlu0 %776 }
 0x82a   :  { %1243 = vmatpush3.msra.mxu1 %v777_v2 }
 0x82b   :  { %1258 = vmatprep.subr.mxu1 %v1444_v0 }
 0x82d   :  { %v598_v3 = vpop.permute.xlu0 %597 }
 0x82e   :  { %v600_v4 = vsub.f32 %v1541_v5, %v598_v3 }
 0x830   :  { %v601_v7 = vmul.f32 %v1302_v6, %v600_v4 }
 0x832   :  { %603 = vrot.lane.b32.xlu1 %v601_v7, %s1448_s7 }
 0x833   :  { %v1304_v8 = vpop.eup %1303 }
 0x834   :  { %v775_v9 = vmul.f32 %v1304_v8, %v1298_v56 }
 0x836   :  { %1245 = vmatmul.mubr.msk.f32.vlgmr.msra.gmra.mxu1 %vm273_vm2, %v775_v9 }
 0x837   :  { %1259 = vmatpush3.msra.mxu1 %v1575_v27  ;;  %1266 = vmatprep.mubr.msk.f32.mxu1 %vm1445_vm0, %v1444_v0 }
 0x838   :  { %1260 = vmatprep.subr.mxu1 %v1444_v0 }
 0x839   :  { %1261 = vmatpush3.msra.mxu1 %v1577_v28 }
 0x83a   :  { %1262 = vmatprep.subr.mxu1 %v1444_v0 }
 0x83b   :  { %1263 = vmatpush3.msra.mxu1 %v1581_v29 }
 0x83c   :  { %1264 = vmatprep.subr.mxu1 %v1444_v0 }
 0x83d   :  { %1265 = vmatpush3.msra.mxu1 %v1601_v35 }
 0x8a4   :  { %v604_v27 = vpop.permute.xlu1 %603 }
 0x8a5   :  { %v606_v28 = vadd.f32 %v604_v27, %v1654_v60 }
 0x8f6   :  { %v848_v10 = vpop.f32.mrf.mxu1 }
 0x8f7   :  { %1256 = vmatmul.mubr.msk.f32.vlgmr.msra.gmra.mxu0 %vm122_vm1, %v848_v10 }
 0x8f8   :  { %1270 = vmatpush3.msra.mxu0 %v1587_v30  ;;  %v1246_v11 = vpop.f32.mrf.mxu1  ;;  %1277 = vmatprep.mubr.msk.f32.mxu0 %vm1445_vm0, %v1444_v0 }
 0x8f9   :  { %1271 = vmatprep.subr.mxu0 %v1444_v0 }
 0x8fa   :  { %1272 = vmatpush3.msra.mxu0 %v1590_v32 }
 0x8fb   :  { %1273 = vmatprep.subr.mxu0 %v1444_v0 }
 0x8fc   :  { %1274 = vmatpush3.msra.mxu0 %v1598_v34 }
 0x8fd   :  { %1275 = vmatprep.subr.mxu0 %v1444_v0 }
 0x8fe   :  { %1276 = vmatpush3.msra.mxu0 %v1605_v36 }
 0x8ff   :  { %1278 = vmatmul.mubr.msk.f32.vlgmr.msra.gmra.mxu0 %vm122_vm1, %v1632_v41 }
 0x9b7   :  { %v921_v12 = vpop.f32.mrf.mxu0 }
 0x9b8   :  { %v922_v13 = vadd.f32 %v1621_v37, %v921_v12 }
 0x9b9   :  { %v1257_v14 = vpop.f32.mrf.mxu0 }
 0x9ba   :  { %1267 = vmatmul.mubr.msk.f32.vlgmr.msra.gmra.mxu1 %vm122_vm1, %v922_v13 }
 0x9bf   :  { %v1064_v15 = vpop.f32.mrf.mxu0 }
 0x9c1   :  { %v1279_v16 = vpop.f32.mrf.mxu0 }
 0xa7a   :  { %v994_v17 = vpop.f32.mrf.mxu1 }
 0xa7b   :  { %v1065_v18 = vadd.f32 %v1064_v15, %v994_v17 }
 0xa7c   :  { %v1268_v19 = vpop.f32.mrf.mxu1 }
 0xa7d   :  { %v1068_v20 = vadd.f32 %v1114_v59, %v1065_v18 }
 0xa7f   :  { %v1075_v21 = vsub.f32 %v1541_v5, %v1068_v20  ;;  %v1123_v0 = vmul.f32 -1.442695, %v1068_v20 }
 0xa81   :  { %1077 = vrot.lane.b32.xlu0 %v1075_v21, %s1446_s29  ;;  %1305 = vpow2.f32 %v1123_v0 }
 0xa8e   :  { %v1306_v22 = vpop.eup %1305 }
 0xa8f   :  { %v1072_v23 = vadd.f32 1.0, %v1306_v22 }
 0xa91   :  { %1307 = vrcp.f32 %v1072_v23 }
 0xa9e   :  { %v1308_v24 = vpop.eup %1307 }
 0xaf3   :  { %v1078_v25 = vpop.permute.xlu0 %1077 }
 0xaf4   :  { %v1080_v26 = vmul.f32 %v1308_v24, %v1078_v25 }
 0xaf6   :  { %1082 = vrot.lane.b32.xlu0 %v1080_v26, %s1448_s7 }
 0xafa   :  { %608 = vrot.lane.b32.xlu0 %v606_v28, %s1446_s29 }
 0xb68   :  { %v1083_v29 = vpop.permute.xlu0 %1082 }
 0xb69   :  { %v1085_v5 = vadd.f32 %v1083_v29, %v1068_v20 }
 0xb6c   :  { %v609_v30 = vpop.permute.xlu0 %608 }
 0xb6d   :  { %611 = vst.msk [vmem:[#allocation11] sm:$0xff] %vm122_vm1, %v609_v30 }
 0xb6e   :  { %1087 = vst.msk [vmem:[#allocation11] sm:$0xff] %vm1086_vm3, %v1085_v5 }
 0xb6f   :  { %1420 = shalt.err (!%p1417_p1)
}
 0xb70   :  { %1097 = dma.vmem_to_hbm [thread:$0]  %s1095_s12, 128, %s1703_s8, [#allocation4]  }
 0xb71   :  { %1435 = dma.done.wait [#allocation4], 128  }
 0xb72   :  { %1436 = vsyncadd [#allocation4], 4294967168 }
 0xb73   :  { %1101 = vsyncpa [#allocation3], 1 }
 0xb74   :  { %1102 = vsyncpa [#allocation6], 1 }
 0xb75   :  { %1103 = vsyncpa [#allocation9], 1 }
 0xb76   :  { %1104 = vsyncpa [#allocation4], 1 }

// kernel: tpu_custom_call.1
= control target key start
LH: loop header
LB: loop body
LE: loop exit
PB: predicated region body
PF: predicated region fallthrough
CT: control target
= control target key end

     0   :  { %13 = vsyncpa [#allocation3], 0  ;;  %s1695_s0 = inlined_call_operand.hbm [shape: f32[8,64], index: 0, kind: input, shape index: {}]   ;;  %s1696_s1 = inlined_call_operand.hbm [shape: f32[32,96], index: 1, kind: input, shape index: {}]   ;;  %s1697_s2 = inlined_call_operand.vmem [shape: f32[1,96], index: 2, kind: input, shape index: {}]   ;;  %s1698_s3 = inlined_call_operand.hbm [shape: f32[32,32], index: 3, kind: input, shape index: {}]   ;;  %s1699_s4 = inlined_call_operand.vmem [shape: f32[1,32], index: 4, kind: input, shape index: {}]   ;;  %s1700_s5 = inlined_call_operand.hbm [shape: f32[32,64], index: 5, kind: input, shape index: {}]   ;;  %s1701_s6 = inlined_call_operand.hbm [shape: f32[32,64], index: 6, kind: input, shape index: {}]   ;;  %s1702_s7 = inlined_call_operand.vmem [shape: f32[1,64], index: 7, kind: input, shape index: {}]   ;;  %s1703_s8 = inlined_call_operand.hbm [shape: f32[8,64], index: 8, kind: output, shape index: {}]  }
   0x1   :  { %14 = vsyncpa [#allocation6], 0 }
   0x2   :  { %15 = vsyncpa [#allocation9], 0 }
   0x3   :  { %16 = vsyncpa [#allocation4], 0  ;;  %s1437_s27 = smov [#allocation5]  }
   0x4   :  { %s32_s28 = sshll.u32 %s1437_s27, 4  ;;  %s33_s28 = int_to_ptr.vmem [resolvable:$true] %s32_s28 }
   0x5   :  { %s1317_s29 = scalar_lea.vmem %s33_s28, 512  ;;  %p1322_p1 = scmp.lt.s32.totalorder %s33_s28, %s33_s28 }
   0x6   :  { %p1318_p0 = scmp.ne.s32.totalorder %s33_s28, %s1317_s29  ;;  %p1323_p2 = scmp.lt.s32.totalorder %s1317_s29, %s1317_s29 }
   0x8   :  { %p1324_p3 = por %p1323_p2, %p1322_p1 }
   0xa   :  { %p1325_p4 = pnand %p1324_p3, %p1318_p0 }
   0xc   :  { %1328 = shalt.err (!%p1325_p4)
}
   0xd   :  { %s1438_s30 = smov 128   ;;  %s1439_s9 = smov 8  }
   0xe   :  { %38 = dma.hbm_to_vmem [thread:$0]  %s1696_s1, 512, %s33_s28, [#allocation6], %s1438_s30, %s1438_s30, %s1439_s9  }
   0xf   :  { %s1440_s12 = smov [#allocation8]   ;;  %s1441_s14 = smov [#allocation2]  }
  0x10   :  { %s60_s13 = sshll.u32 %s1440_s12, 4  ;;  %s23_s15 = sshll.u32 %s1441_s14, 4  ;;  %s61_s13 = int_to_ptr.vmem [resolvable:$true] %s60_s13  ;;  %s24_s15 = int_to_ptr.vmem [resolvable:$true] %s23_s15 }
  0x11   :  { %s1337_s16 = scalar_lea.vmem %s61_s13, 512  ;;  %p1342_p6 = scmp.lt.s32.totalorder %s61_s13, %s61_s13 }
  0x12   :  { %p1338_p5 = scmp.ne.s32.totalorder %s61_s13, %s1337_s16  ;;  %p1343_p7 = scmp.lt.s32.totalorder %s1337_s16, %s1337_s16 }
  0x14   :  { %p1344_p8 = por %p1343_p7, %p1342_p6 }
  0x16   :  { %p1345_p9 = pnand %p1344_p8, %p1338_p5 }
  0x18   :  { %1348 = shalt.err (!%p1345_p9)
}
  0x19   :  { %66 = dma.hbm_to_vmem [thread:$0]  %s1700_s5, 512, %s61_s13, [#allocation9], %s1438_s30, %s1438_s30, %s1439_s9  }
  0x1a   :  { %s1357_s1 = scalar_lea.vmem %s24_s15, 128  ;;  %p1362_p11 = scmp.lt.s32.totalorder %s24_s15, %s24_s15 }
  0x1b   :  { %p1358_p10 = scmp.ne.s32.totalorder %s24_s15, %s1357_s1  ;;  %p1363_p12 = scmp.lt.s32.totalorder %s1357_s1, %s1357_s1 }
  0x1d   :  { %p1364_p13 = por %p1363_p12, %p1362_p11 }
  0x1f   :  { %p1365_p0 = pnand %p1364_p13, %p1358_p10 }
  0x21   :  { %1368 = shalt.err (!%p1365_p0)
}
  0x22   :  { %26 = dma.hbm_to_vmem [thread:$0]  %s1695_s0, 128, %s24_s15, [#allocation3]  }
  0x23   :  { %s1442_s21 = smov [#allocation7]   ;;  %s1443_s23 = smov [#allocation10]  }
  0x24   :  { %s46_s22 = sshll.u32 %s1442_s21, 4  ;;  %s72_s24 = sshll.u32 %s1443_s23, 4  ;;  %s47_s22 = int_to_ptr.vmem [resolvable:$true] %s46_s22  ;;  %s73_s24 = int_to_ptr.vmem [resolvable:$true] %s72_s24 }
  0x25   :  { %s1377_s25 = scalar_lea.vmem %s47_s22, 512  ;;  %p1382_p2 = scmp.lt.s32.totalorder %s47_s22, %s47_s22 }
  0x26   :  { %p1378_p1 = scmp.ne.s32.totalorder %s47_s22, %s1377_s25  ;;  %p1383_p3 = scmp.lt.s32.totalorder %s1377_s25, %s1377_s25 }
  0x28   :  { %p1384_p4 = por %p1383_p3, %p1382_p2 }
  0x2a   :  { %p1385_p5 = pnand %p1384_p4, %p1378_p1 }
  0x2c   :  { %1388 = shalt.err (!%p1385_p5)
}
  0x2d   :  { %52 = dma.hbm_to_vmem [thread:$0]  %s1698_s3, 512, %s47_s22, [#allocation6], %s1438_s30, %s1438_s30, %s1439_s9  }
  0x2e   :  { %s1397_s0 = scalar_lea.vmem %s73_s24, 512  ;;  %p1402_p7 = scmp.lt.s32.totalorder %s73_s24, %s73_s24 }
  0x2f   :  { %p1398_p6 = scmp.ne.s32.totalorder %s73_s24, %s1397_s0  ;;  %p1403_p8 = scmp.lt.s32.totalorder %s1397_s0, %s1397_s0 }
  0x31   :  { %p1404_p9 = por %p1403_p8, %p1402_p7 }
  0x33   :  { %p1405_p10 = pnand %p1404_p9, %p1398_p6 }
  0x35   :  { %1408 = shalt.err (!%p1405_p10)
}
  0x36   :  { %78 = dma.hbm_to_vmem [thread:$0]  %s1701_s6, 512, %s73_s24, [#allocation9], %s1438_s30, %s1438_s30, %s1439_s9  }
  0x37   :  { %1429 = dma.done.wait [#allocation3], 128  }
  0x38   :  { %1430 = vsyncadd [#allocation3], 4294967168 }
  0x39   :  { %1431 = dma.done.wait [#allocation6], 1024  }
  0x3a   :  { %1432 = vsyncadd [#allocation6], 4294966272 }
  0x3b   :  { %1433 = dma.done.wait [#allocation9], 1024  }
  0x3c   :  { %1434 = vsyncadd [#allocation9], 4294966272  ;;  %v1444_v0 = vmov 0.0   ;;  %vm1445_vm0 = vmmov 0   ;;  %v1528_v1 = vld [vmem:[#allocation5 + $0x18] sm:$0xff]  ;;  %v1530_v2 = vld [vmem:[#allocation5 + $0x10] sm:$0xff] }
  0x3d   :  { %1172 = vmatprep.subr.mxu0 %v1444_v0  ;;  %1180 = vmatprep.mubr.msk.f32.mxu0 %vm1445_vm0, %v1444_v0  ;;  %v1534_v3 = vld [vmem:[#allocation5 + $0x8] sm:$0xff]  ;;  %v1538_v4 = vld [vmem:[#allocation5] sm:$0xff]  ;;  %v1541_v5 = vld [vmem:[#allocation2] sm:$0xff]  ;;  %vm122_vm1 = vcmask 261120   ;;  %s1446_s29 = smov 96   ;;  %vm273_vm2 = vcmask 64512  }
  0x3e   :  { %1183 = vmatprep.subr.mxu1 %v1444_v0  ;;  %1185 = vmatprep.mubr.msk.f32.mxu1 %vm1445_vm0, %v1444_v0  ;;  %v1553_v6 = vld [vmem:[%s1697_s2] ss:$0 sm:$0xff]  ;;  %s1447_s2 = smov 64   ;;  %v102_v20 = vld [vmem:[#allocation7 + $0x10] sm:$0xff]  ;;  %v101_v21 = vld [vmem:[#allocation7 + $0x8] sm:$0xff]  ;;  %s1449_s11 = smov [#allocation11]  }
  0x3f   :  { %1173 = vmatpush3.msra.mxu0 %v1528_v1  ;;  %v103_v19 = vld [vmem:[#allocation7 + $0x18] sm:$0xff]  ;;  %v100_v26 = vld [vmem:[#allocation7] sm:$0xff]  ;;  %v1577_v28 = vld [vmem:[#allocation10 + $0x10] sm:$0xff]  ;;  %s1094_s12 = sshll.u32 %s1449_s11, 4  ;;  %vm1086_vm3 = vcmask 523520   ;;  %s1095_s12 = int_to_ptr.vmem [resolvable:$true] %s1094_s12 }
  0x40   :  { %1174 = vmatprep.subr.mxu0 %v1444_v0  ;;  %v1575_v27 = vld [vmem:[#allocation10 + $0x18] sm:$0xff]  ;;  %v1581_v29 = vld [vmem:[#allocation10 + $0x8] sm:$0xff]  ;;  %v1590_v32 = vld [vmem:[#allocation8 + $0x10] sm:$0xff]  ;;  %s1409_s13 = scalar_lea.vmem %s1095_s12, 128  ;;  %p1414_p12 = scmp.lt.s32.totalorder %s1095_s12, %s1095_s12 }
  0x41   :  { %1175 = vmatpush3.msra.mxu0 %v1530_v2  ;;  %v1587_v30 = vld [vmem:[#allocation8 + $0x18] sm:$0xff]  ;;  %v1598_v34 = vld [vmem:[#allocation8 + $0x8] sm:$0xff]  ;;  %v1601_v35 = vld [vmem:[#allocation10] sm:$0xff]  ;;  %p1410_p11 = scmp.ne.s32.totalorder %s1095_s12, %s1409_s13  ;;  %p1415_p13 = scmp.lt.s32.totalorder %s1409_s13, %s1409_s13 }
  0x42   :  { %1176 = vmatprep.subr.mxu0 %v1444_v0  ;;  %v1605_v36 = vld [vmem:[#allocation8] sm:$0xff]  ;;  %v1621_v37 = vld [vmem:[%s1699_s4] ss:$0 sm:$0xff] }
  0x43   :  { %1177 = vmatpush3.msra.mxu0 %v1534_v3  ;;  %v1114_v59 = vld [vmem:[%s1702_s7] ss:$0 sm:$0xff]  ;;  %s1448_s7 = smov 32   ;;  %p1416_p0 = por %p1415_p13, %p1414_p12 }
  0x44   :  { %1178 = vmatprep.subr.mxu0 %v1444_v0 }
  0x45   :  { %1179 = vmatpush3.msra.mxu0 %v1538_v4  ;;  %p1417_p1 = pnand %p1416_p0, %p1410_p11 }
  0x46   :  { %1181 = vmatmul.mubr.msk.f32.vlgmr.msra.gmra.mxu0 %vm122_vm1, %v1541_v5  ;;  %1193 = vmatprep.subr.mxu0 %v1444_v0 }
  0x47   :  { %1201 = vmatprep.mubr.msk.f32.mxu0 %vm1445_vm0, %v1444_v0  ;;  %1194 = vmatpush3.msra.mxu0 %v103_v19 }
  0x48   :  { %1195 = vmatprep.subr.mxu0 %v1444_v0 }
  0x49   :  { %1196 = vmatpush3.msra.mxu0 %v102_v20 }
  0x4a   :  { %1197 = vmatprep.subr.mxu0 %v1444_v0 }
  0x4b   :  { %1198 = vmatpush3.msra.mxu0 %v101_v21 }
  0x4c   :  { %1199 = vmatprep.subr.mxu0 %v1444_v0 }
  0x4d   :  { %1200 = vmatpush3.msra.mxu0 %v100_v26 }
  0x4e   :  { %1215 = vmatprep.subr.mxu0 %v1444_v0 }
 0x106   :  { %v192_v7 = vpop.f32.mrf.mxu0 }
 0x107   :  { %v193_v8 = vadd.f32 %v1553_v6, %v192_v7 }
 0x108   :  { %v1182_v9 = vpop.f32.mrf.mxu0 }
 0x109   :  { %197 = vrot.lane.b32.xlu0 %v193_v8, %s1446_s29 }
 0x17b   :  { %v198_v10 = vpop.permute.xlu0 %197 }
 0x17c   :  { %1184 = vmatpush3.xpose.msk.msra.mxu1 %vm122_vm1, %v198_v10 }
 0x17d   :  { %1188 = vmatprep.subr.mxu1 %v1444_v0 }
 0x17f   :  { %1186 = vmatmul.mubr.msk.f32.vlgmr.msra.gmra.mxu1 %vm122_vm1, %v193_v8 }
 0x180   :  { %1190 = vmatprep.mubr.msk.f32.mxu1 %vm1445_vm0, %v1444_v0 }
 0x23f   :  { %v269_v11 = vpop.f32.mrf.mxu1 }
 0x240   :  { %v274_v12 = vsel %vm273_vm2, %v269_v11, -inf }
 0x241   :  { %275 = vmax.xlane.f32.xlu0 %v274_v12  ;;  %v1187_v13 = vpop.f32.mrf.mxu1 }
 0x2ca   :  { %v276_v14 = vpop.xlane.xlu0 %275 }
 0x2cb   :  { %v277_v15 = vsub.f32 %v269_v11, %v276_v14 }
 0x2cd   :  { %v278_v16 = vmul.f32 1.442695, %v277_v15 }
 0x2cf   :  { %1293 = vpow2.f32 %v278_v16 }
 0x2dc   :  { %v1294_v17 = vpop.eup %1293 }
 0x2dd   :  { %v280_v18 = vsel %vm273_vm2, %v1294_v17, 0.0 }
 0x2de   :  { %281 = vadd.xlane.f32.xlu1 %v280_v18 }
 0x2ef   :  { %285 = vrot.lane.b32.xlu1 %v193_v8, %s1447_s2 }
 0x2f3   :  { %614 = vrot.lane.b32.xlu1 %v1541_v5, %s1446_s29 }
 0x367   :  { %v282_v22 = vpop.xlane.xlu1 %281 }
 0x368   :  { %1295 = vrcp.f32 %v282_v22 }
 0x36b   :  { %v286_v23 = vpop.permute.xlu1 %285 }
 0x36c   :  { %1189 = vmatpush3.msra.mxu1 %v286_v23 }
 0x36d   :  { %1204 = vmatprep.subr.mxu1 %v1444_v0 }
 0x36f   :  { %v1632_v41 = vpop.permute.xlu1 %614 }
 0x375   :  { %v1296_v24 = vpop.eup %1295 }
 0x376   :  { %v284_v25 = vmul.f32 %v1296_v24, %v1294_v17 }
 0x378   :  { %1191 = vmatmul.mubr.msk.f32.vlgmr.msra.gmra.mxu1 %vm273_vm2, %v284_v25 }
 0x379   :  { %1212 = vmatprep.mubr.msk.f32.mxu1 %vm1445_vm0, %v1444_v0  ;;  %1205 = vmatpush3.msra.mxu1 %v1575_v27 }
 0x37a   :  { %1206 = vmatprep.subr.mxu1 %v1444_v0 }
 0x37b   :  { %1207 = vmatpush3.msra.mxu1 %v1577_v28 }
 0x37c   :  { %1208 = vmatprep.subr.mxu1 %v1444_v0 }
 0x37d   :  { %1209 = vmatpush3.msra.mxu1 %v1581_v29 }
 0x37e   :  { %1210 = vmatprep.subr.mxu1 %v1444_v0 }
 0x37f   :  { %1211 = vmatpush3.msra.mxu1 %v1601_v35 }
 0x380   :  { %1226 = vmatprep.subr.mxu1 %v1444_v0 }
 0x438   :  { %v357_v31 = vpop.f32.mrf.mxu1 }
 0x439   :  { %1202 = vmatmul.mubr.msk.f32.vlgmr.msra.gmra.mxu0 %vm122_vm1, %v357_v31 }
 0x43a   :  { %v1192_v33 = vpop.f32.mrf.mxu1  ;;  %1216 = vmatpush3.msra.mxu0 %v1587_v30  ;;  %1223 = vmatprep.mubr.msk.f32.mxu0 %vm1445_vm0, %v1444_v0 }
 0x43b   :  { %1217 = vmatprep.subr.mxu0 %v1444_v0 }
 0x43c   :  { %1218 = vmatpush3.msra.mxu0 %v1590_v32 }
 0x43d   :  { %1219 = vmatprep.subr.mxu0 %v1444_v0 }
 0x43e   :  { %1220 = vmatpush3.msra.mxu0 %v1598_v34 }
 0x43f   :  { %1221 = vmatprep.subr.mxu0 %v1444_v0 }
 0x440   :  { %1222 = vmatpush3.msra.mxu0 %v1605_v36 }
 0x441   :  { %1224 = vmatmul.mubr.msk.f32.vlgmr.msra.gmra.mxu0 %vm122_vm1, %v1541_v5  ;;  %1247 = vmatprep.subr.mxu0 %v1444_v0 }
 0x442   :  { %1248 = vmatpush3.msra.mxu0 %v103_v19  ;;  %1255 = vmatprep.mubr.msk.f32.mxu0 %vm1445_vm0, %v1444_v0 }
 0x443   :  { %1249 = vmatprep.subr.mxu0 %v1444_v0 }
 0x444   :  { %1250 = vmatpush3.msra.mxu0 %v102_v20 }
 0x445   :  { %1251 = vmatprep.subr.mxu0 %v1444_v0 }
 0x446   :  { %1252 = vmatpush3.msra.mxu0 %v101_v21 }
 0x447   :  { %1253 = vmatprep.subr.mxu0 %v1444_v0 }
 0x448   :  { %1254 = vmatpush3.msra.mxu0 %v100_v26 }
 0x449   :  { %1269 = vmatprep.subr.mxu0 %v1444_v0 }
 0x4f9   :  { %v436_v38 = vpop.f32.mrf.mxu0 }
 0x4fa   :  { %v437_v39 = vadd.f32 %v1621_v37, %v436_v38 }
 0x4fb   :  { %v1203_v40 = vpop.f32.mrf.mxu0 }
 0x4fc   :  { %1213 = vmatmul.mubr.msk.f32.vlgmr.msra.gmra.mxu1 %vm122_vm1, %v437_v39 }
 0x4fd   :  { %1227 = vmatpush3.msra.mxu1 %v1528_v1  ;;  %1234 = vmatprep.mubr.msk.f32.mxu1 %vm1445_vm0, %v1444_v0 }
 0x4fe   :  { %1228 = vmatprep.subr.mxu1 %v1444_v0 }
 0x4ff   :  { %1229 = vmatpush3.msra.mxu1 %v1530_v2 }
 0x500   :  { %1230 = vmatprep.subr.mxu1 %v1444_v0 }
 0x501   :  { %1231 = vmatpush3.msra.mxu1 %v1534_v3  ;;  %v579_v42 = vpop.f32.mrf.mxu0 }
 0x502   :  { %1232 = vmatprep.subr.mxu1 %v1444_v0 }
 0x503   :  { %1233 = vmatpush3.msra.mxu1 %v1538_v4  ;;  %v1225_v43 = vpop.f32.mrf.mxu0 }
 0x504   :  { %1235 = vmatmul.mubr.msk.f32.vlgmr.msra.gmra.mxu1 %vm122_vm1, %v1632_v41  ;;  %1237 = vmatprep.subr.mxu1 %v1444_v0 }
 0x505   :  { %1239 = vmatprep.mubr.msk.f32.mxu1 %vm1445_vm0, %v1444_v0 }
 0x5bc   :  { %v509_v44 = vpop.f32.mrf.mxu1 }
 0x5bd   :  { %v580_v58 = vadd.f32 %v579_v42, %v509_v44 }
 0x5be   :  { %v1214_v45 = vpop.f32.mrf.mxu1 }
 0x5bf   :  { %v1654_v60 = vadd.f32 %v1114_v59, %v580_v58 }
 0x5c1   :  { %v1115_v61 = vmul.f32 -1.442695, %v1654_v60 }
 0x5c4   :  { %v684_v46 = vpop.f32.mrf.mxu1 }
 0x5c5   :  { %v685_v47 = vadd.f32 %v1553_v6, %v684_v46 }
 0x5c6   :  { %v1236_v48 = vpop.f32.mrf.mxu1 }
 0x5c7   :  { %689 = vrot.lane.b32.xlu1 %v685_v47, %s1446_s29 }
 0x639   :  { %v690_v49 = vpop.permute.xlu1 %689 }
 0x63a   :  { %1238 = vmatpush3.xpose.msk.msra.mxu1 %vm122_vm1, %v690_v49 }
 0x63b   :  { %1242 = vmatprep.subr.mxu1 %v1444_v0 }
 0x63d   :  { %1240 = vmatmul.mubr.msk.f32.vlgmr.msra.gmra.mxu1 %vm122_vm1, %v685_v47 }
 0x63e   :  { %1244 = vmatprep.mubr.msk.f32.mxu1 %vm1445_vm0, %v1444_v0 }
 0x6fd   :  { %v761_v50 = vpop.f32.mrf.mxu1 }
 0x6fe   :  { %v765_v51 = vsel %vm273_vm2, %v761_v50, -inf }
 0x6ff   :  { %766 = vmax.xlane.f32.xlu1 %v765_v51  ;;  %v1241_v52 = vpop.f32.mrf.mxu1 }
 0x788   :  { %v767_v53 = vpop.xlane.xlu1 %766 }
 0x789   :  { %v768_v54 = vsub.f32 %v761_v50, %v767_v53 }
 0x78b   :  { %v769_v55 = vmul.f32 1.442695, %v768_v54 }
 0x78d   :  { %1297 = vpow2.f32 %v769_v55 }
 0x78e   :  { %1299 = vpow2.f32 %v1115_v61 }
 0x79a   :  { %v1298_v56 = vpop.eup %1297 }
 0x79b   :  { %v771_v57 = vsel %vm273_vm2, %v1298_v56, 0.0  ;;  %v1300_v62 = vpop.eup %1299 }
 0x79c   :  { %772 = vadd.xlane.f32.xlu0 %v771_v57  ;;  %v593_v63 = vadd.f32 1.0, %v1300_v62 }
 0x79e   :  { %1301 = vrcp.f32 %v593_v63 }
 0x7ab   :  { %v1302_v6 = vpop.eup %1301 }
 0x7b2   :  { %776 = vrot.lane.b32.xlu0 %v685_v47, %s1447_s2 }
 0x7b6   :  { %597 = vrot.lane.b32.xlu0 %v1654_v60, %s1446_s29 }
 0x825   :  { %v773_v1 = vpop.xlane.xlu0 %772 }
 0x826   :  { %1303 = vrcp.f32 %v773_v1 }
 0x829   :  { %v777_v2 = vpop.permute.xlu0 %776 }
 0x82a   :  { %1243 = vmatpush3.msra.mxu1 %v777_v2 }
 0x82b   :  { %1258 = vmatprep.subr.mxu1 %v1444_v0 }
 0x82d   :  { %v598_v3 = vpop.permute.xlu0 %597 }
 0x82e   :  { %v600_v4 = vsub.f32 %v1541_v5, %v598_v3 }
 0x830   :  { %v601_v7 = vmul.f32 %v1302_v6, %v600_v4 }
 0x832   :  { %603 = vrot.lane.b32.xlu1 %v601_v7, %s1448_s7 }
 0x833   :  { %v1304_v8 = vpop.eup %1303 }
 0x834   :  { %v775_v9 = vmul.f32 %v1304_v8, %v1298_v56 }
 0x836   :  { %1245 = vmatmul.mubr.msk.f32.vlgmr.msra.gmra.mxu1 %vm273_vm2, %v775_v9 }
 0x837   :  { %1259 = vmatpush3.msra.mxu1 %v1575_v27  ;;  %1266 = vmatprep.mubr.msk.f32.mxu1 %vm1445_vm0, %v1444_v0 }
 0x838   :  { %1260 = vmatprep.subr.mxu1 %v1444_v0 }
 0x839   :  { %1261 = vmatpush3.msra.mxu1 %v1577_v28 }
 0x83a   :  { %1262 = vmatprep.subr.mxu1 %v1444_v0 }
 0x83b   :  { %1263 = vmatpush3.msra.mxu1 %v1581_v29 }
 0x83c   :  { %1264 = vmatprep.subr.mxu1 %v1444_v0 }
 0x83d   :  { %1265 = vmatpush3.msra.mxu1 %v1601_v35 }
 0x8a4   :  { %v604_v27 = vpop.permute.xlu1 %603 }
 0x8a5   :  { %v606_v28 = vadd.f32 %v604_v27, %v1654_v60 }
 0x8f6   :  { %v848_v10 = vpop.f32.mrf.mxu1 }
 0x8f7   :  { %1256 = vmatmul.mubr.msk.f32.vlgmr.msra.gmra.mxu0 %vm122_vm1, %v848_v10 }
 0x8f8   :  { %1270 = vmatpush3.msra.mxu0 %v1587_v30  ;;  %v1246_v11 = vpop.f32.mrf.mxu1  ;;  %1277 = vmatprep.mubr.msk.f32.mxu0 %vm1445_vm0, %v1444_v0 }
 0x8f9   :  { %1271 = vmatprep.subr.mxu0 %v1444_v0 }
 0x8fa   :  { %1272 = vmatpush3.msra.mxu0 %v1590_v32 }
 0x8fb   :  { %1273 = vmatprep.subr.mxu0 %v1444_v0 }
 0x8fc   :  { %1274 = vmatpush3.msra.mxu0 %v1598_v34 }
 0x8fd   :  { %1275 = vmatprep.subr.mxu0 %v1444_v0 }
 0x8fe   :  { %1276 = vmatpush3.msra.mxu0 %v1605_v36 }
 0x8ff   :  { %1278 = vmatmul.mubr.msk.f32.vlgmr.msra.gmra.mxu0 %vm122_vm1, %v1632_v41 }
 0x9b7   :  { %v921_v12 = vpop.f32.mrf.mxu0 }
 0x9b8   :  { %v922_v13 = vadd.f32 %v1621_v37, %v921_v12 }
 0x9b9   :  { %v1257_v14 = vpop.f32.mrf.mxu0 }
 0x9ba   :  { %1267 = vmatmul.mubr.msk.f32.vlgmr.msra.gmra.mxu1 %vm122_vm1, %v922_v13 }
 0x9bf   :  { %v1064_v15 = vpop.f32.mrf.mxu0 }
 0x9c1   :  { %v1279_v16 = vpop.f32.mrf.mxu0 }
 0xa7a   :  { %v994_v17 = vpop.f32.mrf.mxu1 }
 0xa7b   :  { %v1065_v18 = vadd.f32 %v1064_v15, %v994_v17 }
 0xa7c   :  { %v1268_v19 = vpop.f32.mrf.mxu1 }
 0xa7d   :  { %v1068_v20 = vadd.f32 %v1114_v59, %v1065_v18 }
 0xa7f   :  { %v1075_v21 = vsub.f32 %v1541_v5, %v1068_v20  ;;  %v1123_v0 = vmul.f32 -1.442695, %v1068_v20 }
 0xa81   :  { %1077 = vrot.lane.b32.xlu0 %v1075_v21, %s1446_s29  ;;  %1305 = vpow2.f32 %v1123_v0 }
 0xa8e   :  { %v1306_v22 = vpop.eup %1305 }
 0xa8f   :  { %v1072_v23 = vadd.f32 1.0, %v1306_v22 }
 0xa91   :  { %1307 = vrcp.f32 %v1072_v23 }
 0xa9e   :  { %v1308_v24 = vpop.eup %1307 }
 0xaf3   :  { %v1078_v25 = vpop.permute.xlu0 %1077 }
 0xaf4   :  { %v1080_v26 = vmul.f32 %v1308_v24, %v1078_v25 }
 0xaf6   :  { %1082 = vrot.lane.b32.xlu0 %v1080_v26, %s1448_s7 }
 0xafa   :  { %608 = vrot.lane.b32.xlu0 %v606_v28, %s1446_s29 }
 0xb68   :  { %v1083_v29 = vpop.permute.xlu0 %1082 }
 0xb69   :  { %v1085_v5 = vadd.f32 %v1083_v29, %v1068_v20 }
 0xb6c   :  { %v609_v30 = vpop.permute.xlu0 %608 }
 0xb6d   :  { %611 = vst.msk [vmem:[#allocation11] sm:$0xff] %vm122_vm1, %v609_v30 }
 0xb6e   :  { %1087 = vst.msk [vmem:[#allocation11] sm:$0xff] %vm1086_vm3, %v1085_v5 }
 0xb6f   :  { %1420 = shalt.err (!%p1417_p1)
}
 0xb70   :  { %1097 = dma.vmem_to_hbm [thread:$0]  %s1095_s12, 128, %s1703_s8, [#allocation4]  }
 0xb71   :  { %1435 = dma.done.wait [#allocation4], 128  }
 0xb72   :  { %1436 = vsyncadd [#allocation4], 4294967168 }
 0xb73   :  { %1101 = vsyncpa [#allocation3], 1 }
 0xb74   :  { %1102 = vsyncpa [#allocation6], 1 }
 0xb75   :  { %1103 = vsyncpa [#allocation9], 1 }
 0xb76   :  { %1104 = vsyncpa [#allocation4], 1 }

</bundles_post_ra>
